<compile_context>
chip_gen: v7x
topology: tpu7x:2x2x1
jax: 0.10.0
libtpu: 0.0.40
codegen_flags: <defaults>
</compile_context>

<pallas_src>
import functools

import jax
import jax.numpy as jnp
from jax import lax
from jax.experimental import pallas as pl
from jax.experimental.pallas import tpu as pltpu

LANE = 128      # vreg lane width  -> hidden/feature dims padded to a multiple of this
SUBLANE = 8     # vreg sublane width -> batch padded to a multiple of this


def _round_up(x, m):
    return (x + m - 1) // m * m


# ------------------------------------------------------------------------------------
# Fused bidirectional LSTM recurrence kernel (one layer).
#   grid = (direction, time_chunk); direction is "parallel" (2 TCs on v7x),
#   time_chunk is "arbitrary" and carries h/c in VMEM scratch.
#   Per chunk: one (chunk*B, D) x (D, 4H) MXU matmul computes the x-part of all gates,
#   then an unrolled loop runs the serial h @ W_hh recurrence.
#   The backward direction consumes chunks in reversed order (index_map) and walks the
#   chunk back-to-front, so hseq is written in natural time order for both directions.
# ------------------------------------------------------------------------------------
def _bilstm_kernel(x_ref, wih_ref, whh_ref, b_ref, len_ref,
                   hseq_ref, hfin_ref,
                   gx_sc, h_sc, c_sc, *, hidden_dim, chunk, unroll):
    d = pl.program_id(0)                 # 0 = forward, 1 = backward
    c_idx = pl.program_id(1)
    num_c = pl.num_programs(1)
    H = hidden_dim
    B, Din = x_ref.shape[1], x_ref.shape[2]

    @pl.when(c_idx == 0)
    def _():
        h_sc[...] = jnp.zeros_like(h_sc)
        c_sc[...] = jnp.zeros_like(c_sc)

    # ---- chunk prologue: x-part of all gates, one lane-dense MXU matmul -------------
    gx = jnp.dot(x_ref[...].reshape(chunk * B, Din), wih_ref[0],
                 preferred_element_type=jnp.float32) + b_ref[0]
    gx_sc[...] = gx.reshape(chunk, B, 4 * H)

    whh = whh_ref[0]                     # (H, 4H) bf16, resident across the chunk
    hi = len_ref[...]                    # (B, 1) int32 sequence lengths
    # global time offset of this chunk (backward streams chunks in reverse order)
    t0 = (c_idx + d * (num_c - 1 - 2 * c_idx)) * chunk

    def step(s, carry):
        h, c = carry
        # local timestep: forward walks 0..chunk-1, backward walks chunk-1..0
        t_loc = s + d * (chunk - 1 - 2 * s)
        gates = gx_sc[t_loc] + jnp.dot(h.astype(jnp.bfloat16), whh,
                                       preferred_element_type=jnp.float32)
        # gate slices are lane-aligned (H is a multiple of 128)
        i_g = jax.nn.sigmoid(gates[:, 0 * H:1 * H])
        f_g = jax.nn.sigmoid(gates[:, 1 * H:2 * H])
        g_g = jnp.tanh(gates[:, 2 * H:3 * H])
        o_g = jax.nn.sigmoid(gates[:, 3 * H:4 * H])
        c_new = f_g * c + i_g * g_g
        h_new = o_g * jnp.tanh(c_new)
        valid = (t0 + t_loc) < hi        # (B, 1) packed-sequence validity
        # pad_packed semantics: hseq is zero on invalid steps (no external mask pass);
        # pack_padded semantics: h/c only advance on valid steps.
        hseq_ref[t_loc] = jnp.where(valid, h_new, 0.0).astype(hseq_ref.dtype)
        return jnp.where(valid, h_new, h), jnp.where(valid, c_new, c)

    h_fin, c_fin = lax.fori_loop(0, chunk, step, (h_sc[...], c_sc[...]),
                                 unroll=unroll)
    h_sc[...] = h_fin
    c_sc[...] = c_fin

    @pl.when(c_idx == num_c - 1)
    def _():
        hfin_ref[0] = h_fin


def bilstm_layer(x, lens, w_ih, w_hh, b, *, chunk, unroll, need_hseq):
    """One bidirectional LSTM layer.

    x:     (T_pad, B_pad, D) bf16, padded timesteps/batch rows are zero.
    lens:  (B_pad, 1) int32 valid lengths (0 for padded batch rows).
    Returns hseq (T_pad, B_pad, 2H) bf16 (next-layer input) and hfin (2, B_pad, H) f32.
    """
    T_pad, B, D = x.shape
    H = w_hh.shape[1]
    G = 4 * H
    NC = T_pad // chunk

    # backward direction (d == 1) consumes time chunks in reverse order
    tmap = lambda d, c: (c + d * (NC - 1 - 2 * c), 0, 0)

    if need_hseq:
        hseq_T = T_pad
        # direction d writes lanes [d*H, (d+1)*H) of the (T_pad, B, 2H) output slab
        hseq_spec = pl.BlockSpec((chunk, B, H),
                                 lambda d, c: (c + d * (NC - 1 - 2 * c), 0, d))
    else:
        # last layer: only hfin feeds the FC — keep one resident chunk-sized hseq
        # block (revisited across the time axis) so there is no full-sequence writeback
        hseq_T = chunk
        hseq_spec = pl.BlockSpec((chunk, B, H), lambda d, c: (0, 0, d))

    kernel = functools.partial(_bilstm_kernel, hidden_dim=H, chunk=chunk,
                               unroll=unroll)
    hseq, hfin = pl.pallas_call(
        kernel,
        out_shape=(jax.ShapeDtypeStruct((hseq_T, B, 2 * H), jnp.bfloat16),
                   jax.ShapeDtypeStruct((2, B, H), jnp.float32)),
        grid=(2, NC),
        in_specs=[pl.BlockSpec((chunk, B, D), tmap),
                  pl.BlockSpec((1, D, G), lambda d, c: (d, 0, 0)),
                  pl.BlockSpec((1, H, G), lambda d, c: (d, 0, 0)),
                  pl.BlockSpec((1, 1, G), lambda d, c: (d, 0, 0)),
                  pl.BlockSpec((B, 1), lambda d, c: (0, 0))],
        out_specs=(hseq_spec,
                   pl.BlockSpec((1, B, H), lambda d, c: (d, 0, 0))),
        scratch_shapes=[pltpu.VMEM((chunk, B, G), jnp.float32),   # gx for the chunk
                        pltpu.VMEM((B, H), jnp.float32),          # h state
                        pltpu.VMEM((B, H), jnp.float32)],         # c state
        compiler_params=pltpu.CompilerParams(
            # direction axis independent -> megacore/2-TC split on v7x
            # (could be pltpu.CORE_PARALLEL to force it); time axis carries state.
            dimension_semantics=("parallel", "arbitrary"),
            vmem_limit_bytes=48 * 1024 * 1024),
    )(x, w_ih, w_hh, b, lens)
    return hseq, hfin


# ------------------------------------------------------------------------------------
# Full model forward
# ------------------------------------------------------------------------------------
def rnn_forward(params, text, text_lengths, *, chunk=32, unroll=8):
    T, B = text.shape
    H = params['hidden_dim']
    lengths = text_lengths.astype(jnp.int32)

    # embedding lookup (XLA gather glue); dropout(embedded): eval mode -> identity
    embedded = params['embedding'][text]                     # (T, B, E_pad) f32

    # pad time to a chunk multiple and batch to a sublane multiple; padded batch rows
    # get length 0 so they never update state and their hseq/hfin rows stay zero.
    chunk = max(SUBLANE, min(chunk, _round_up(T, SUBLANE)))
    unroll = min(unroll, chunk)
    B_pad = _round_up(max(B, SUBLANE), SUBLANE)
    T_pad = _round_up(T, chunk)
    x = jnp.pad(embedded.astype(jnp.bfloat16),
                ((0, T_pad - T), (0, B_pad - B), (0, 0)))
    lens = jnp.pad(lengths, (0, B_pad - B))[:, None]          # (B_pad, 1)

    n_layers = len(params['lstm'])
    hfin = None
    for li, layer in enumerate(params['lstm']):
        need_hseq = li < n_layers - 1     # last layer: only hfin is consumed
        x, hfin = bilstm_layer(x, lens, layer['w_ih'], layer['w_hh'], layer['b'],
                               chunk=chunk, unroll=unroll, need_hseq=need_hseq)
        # inter-layer dropout: eval mode -> identity

    # hidden[-2] (last layer fwd) ++ hidden[-1] (last layer bwd), sliced back to the
    # logical (B, H); dropout eval -> identity.  Final FC stays in plain JAX: a
    # grid=(1,), Dout=1 pallas_call would be pure launch overhead.
    hidden = jnp.concatenate([hfin[0, :B, :H], hfin[1, :B, :H]], axis=-1)
    return hidden @ params['fc_w'] + params['fc_b']


# ------------------------------------------------------------------------------------
# Parameter init (PyTorch-like uniform init, gate order i|f|g|o, weights transposed),
# zero-padded to lane/sublane-friendly kernel shapes: hidden H -> multiple of 128,
# feature dims -> multiple of 128.  Padded units have zero weights/bias, so they stay
# identically zero and the math matches the logical (unpadded) model exactly.
# ------------------------------------------------------------------------------------
def _pad_gate_cols(w, h, h_pad):
    """(..., 4h) -> (..., 4*h_pad): zero-pad each of the i|f|g|o gate blocks."""
    parts = jnp.split(w, 4, axis=-1)
    pad = [(0, 0)] * (w.ndim - 1) + [(0, h_pad - h)]
    return jnp.concatenate([jnp.pad(p, pad) for p in parts], axis=-1)


def _pad_rows(w, rows_pad):
    return jnp.pad(w, ((0, rows_pad - w.shape[0]), (0, 0)))


def _pad_rows_bidir(w, h, h_pad):
    """(2h, G) -> (2*h_pad, G): fwd rows at [0:h], bwd rows at [h_pad:h_pad+h]."""
    out = jnp.zeros((2 * h_pad, w.shape[1]), w.dtype)
    return out.at[:h].set(w[:h]).at[h_pad:h_pad + h].set(w[h:])


def init_params(key, vocab_size, embedding_dim, hidden_dim, output_dim, n_layers,
                pad_idx):
    keys = jax.random.split(key, 3 + n_layers)
    E_pad = _round_up(embedding_dim, LANE)
    H_pad = _round_up(hidden_dim, LANE)

    emb = jax.random.normal(keys[0], (vocab_size, embedding_dim), jnp.float32)
    emb = emb.at[pad_idx].set(0.0)                            # padding_idx row is zero
    emb = jnp.pad(emb, ((0, 0), (0, E_pad - embedding_dim)))  # padded cols are zero

    k = 1.0 / float(hidden_dim) ** 0.5

    def u(key, shape, bound):
        return jax.random.uniform(key, shape, jnp.float32, -bound, bound)

    H, G = hidden_dim, 4 * hidden_dim
    lstm = []
    for l in range(n_layers):
        in_dim = embedding_dim if l == 0 else 2 * hidden_dim
        in_pad = E_pad if l == 0 else 2 * H_pad
        lk = jax.random.split(keys[3 + l], 8)
        w_ih_d, w_hh_d, b_d = [], [], []
        for d in range(2):
            w_ih = u(lk[4 * d + 0], (in_dim, G), k)           # (in, 4H) gate order i|f|g|o
            w_hh = u(lk[4 * d + 1], (H, G), k)
            b = u(lk[4 * d + 2], (G,), k) + u(lk[4 * d + 3], (G,), k)   # b_ih + b_hh
            w_ih = _pad_gate_cols(w_ih, H, H_pad)
            w_hh = _pad_gate_cols(w_hh, H, H_pad)
            b = _pad_gate_cols(b[None, :], H, H_pad)          # (1, 4*H_pad)
            w_ih = _pad_rows(w_ih, in_pad) if l == 0 else _pad_rows_bidir(w_ih, H, H_pad)
            w_hh = _pad_rows(w_hh, H_pad)
            w_ih_d.append(w_ih); w_hh_d.append(w_hh); b_d.append(b)
        lstm.append({'w_ih': jnp.stack(w_ih_d).astype(jnp.bfloat16),   # (2, in_pad, 4H_pad)
                     'w_hh': jnp.stack(w_hh_d).astype(jnp.bfloat16),   # (2, H_pad, 4H_pad)
                     'b': jnp.stack(b_d)})                             # (2, 1, 4H_pad) f32

    kf = 1.0 / float(2 * hidden_dim) ** 0.5
    fc_w = u(keys[1], (2 * hidden_dim, output_dim), kf)
    fc_b = u(keys[2], (output_dim,), kf)
    return {'embedding': emb, 'lstm': lstm, 'fc_w': fc_w, 'fc_b': fc_b,
            'hidden_dim': hidden_dim}


# ------------------------------------------------------------------------------------
# Pure-JAX reference (same packed-sequence semantics, same bf16 rounding points) used
# as an in-script numerics check of the kernel plumbing.
# ------------------------------------------------------------------------------------
def _lstm_reference(params, text, text_lengths):
    T, B = text.shape
    H = params['hidden_dim']
    lengths = text_lengths.astype(jnp.int32)
    x = params['embedding'][text]
    fins = None
    for layer in params['lstm']:
        w_ih = layer['w_ih'].astype(jnp.float32)
        w_hh = layer['w_hh'].astype(jnp.float32)
        b = layer['b'].astype(jnp.float32)
        Hp = w_hh.shape[1]
        x = x.astype(jnp.bfloat16).astype(jnp.float32)        # layer input is bf16
        outs, fins = [], []
        for d in range(2):
            order = range(T) if d == 0 else range(T - 1, -1, -1)
            h = jnp.zeros((B, Hp), jnp.float32)
            c = jnp.zeros((B, Hp), jnp.float32)
            hs = [None] * T
            for t in order:
                g = (x[t] @ w_ih[d] + b[d]
                     + h.astype(jnp.bfloat16).astype(jnp.float32) @ w_hh[d])
                i_g = jax.nn.sigmoid(g[:, :Hp])
                f_g = jax.nn.sigmoid(g[:, Hp:2 * Hp])
                g_g = jnp.tanh(g[:, 2 * Hp:3 * Hp])
                o_g = jax.nn.sigmoid(g[:, 3 * Hp:])
                c_new = f_g * c + i_g * g_g
                h_new = o_g * jnp.tanh(c_new)
                valid = (t < lengths)[:, None]
                h = jnp.where(valid, h_new, h)
                c = jnp.where(valid, c_new, c)
                hs[t] = jnp.where(valid, h_new, 0.0)
            outs.append(jnp.stack(hs))
            fins.append(h)
        x = jnp.concatenate(outs, axis=-1)
    hidden = jnp.concatenate([fins[0][:, :H], fins[1][:, :H]], axis=-1)
    return hidden @ params['fc_w'] + params['fc_b']


if __name__ == "__main__":
    vocab_size, embedding_dim, hidden_dim, output_dim = 50, 16, 32, 1
    n_layers, pad_idx = 2, 0
    T, B = 8, 2

    key = jax.random.PRNGKey(0)
    pkey, tkey = jax.random.split(key)
    params = init_params(pkey, vocab_size, embedding_dim, hidden_dim,
                         output_dim, n_layers, pad_idx)

    # lengths must be descending (pack_padded_sequence default enforce_sorted=True)
    text_lengths = jnp.array([8, 5], dtype=jnp.int32)
    text = jax.random.randint(tkey, (T, B), 1, vocab_size, dtype=jnp.int32)
    t_idx = jnp.arange(T, dtype=jnp.int32)[:, None]
    text = jnp.where(t_idx < text_lengths[None, :], text, pad_idx)

    out = rnn_forward(params, text, text_lengths)
    out = jax.block_until_ready(out)
    assert out.shape == (B, output_dim) and out.dtype == jnp.float32

    # numerics check against the pure-JAX reference (bf16 weights, f32 accumulation)
    ref = jax.block_until_ready(_lstm_reference(params, text, text_lengths))
    assert jnp.allclose(out, ref, atol=5e-2, rtol=5e-2)

    print("KERNEL_OK")
</pallas_src>

<mosaic_0001>
module attributes {stable_mosaic.version = 11 : i64} {
  func.func @_bilstm_kernel(%arg0: i32, %arg1: i32, %arg2: memref<8x8x128xbf16, #tpu.memory_space<vmem>>, %arg3: memref<1x128x512xbf16, #tpu.memory_space<vmem>>, %arg4: memref<1x128x512xbf16, #tpu.memory_space<vmem>>, %arg5: memref<1x1x512xf32, #tpu.memory_space<vmem>>, %arg6: memref<8x1xi32, #tpu.memory_space<vmem>>, %arg7: memref<8x8x128xbf16, #tpu.memory_space<vmem>>, %arg8: memref<1x8x128xf32, #tpu.memory_space<vmem>>, %arg9: memref<8x8x512xf32, #tpu.memory_space<vmem>>, %arg10: memref<8x128xf32, #tpu.memory_space<vmem>>, %arg11: memref<8x128xf32, #tpu.memory_space<vmem>>) attributes {dimension_semantics = [#tpu.dimension_semantics<parallel>, #tpu.dimension_semantics<arbitrary>], iteration_bounds = array<i64: 2, 1>, scalar_prefetch = 0 : i64, scratch_operands = 3 : i64, tpu.core_type = #tpu.core_type<tc>, window_params = [{transform_indices = @transform_0, window_bounds = array<i64: 8, 8, 128>}, {transform_indices = @transform_1, window_bounds = array<i64: 1, 128, 512>}, {transform_indices = @transform_2, window_bounds = array<i64: 1, 128, 512>}, {transform_indices = @transform_3, window_bounds = array<i64: 1, 1, 512>}, {pipeline_mode = #tpu.pipeline_mode<synchronous>, transform_indices = @transform_4, window_bounds = array<i64: 8, 1>}, {transform_indices = @transform_5, window_bounds = array<i64: 8, 8, 128>}, {transform_indices = @transform_6, window_bounds = array<i64: 1, 8, 128>}]} {
    %c0_i32 = arith.constant 0 : i32
    %0 = arith.cmpi eq, %arg1, %c0_i32 : i32
    %1 = arith.extui %0 : i1 to i32
    %c0_i32_0 = arith.constant 0 : i32
    %2 = arith.cmpi ne, %1, %c0_i32_0 : i32
    scf.if %2 {
      %cst_119 = arith.constant 0.000000e+00 : f32
      %453 = vector.broadcast %cst_119 : f32 to vector<8x128xf32>
      %c0_120 = arith.constant 0 : index
      %c0_121 = arith.constant 0 : index
      %454 = vector.load %arg10[%c0_120, %c0_121] : memref<8x128xf32, #tpu.memory_space<vmem>>, vector<8x128xf32>
      tpu.vector_store %arg10[%c0_120, %c0_121], %453 {strides = array<i32>} : memref<8x128xf32, #tpu.memory_space<vmem>>, vector<8x128xf32>,
      %cst_122 = arith.constant 0.000000e+00 : f32
      %455 = vector.broadcast %cst_122 : f32 to vector<8x128xf32>
      %c0_123 = arith.constant 0 : index
      %c0_124 = arith.constant 0 : index
      %456 = vector.load %arg11[%c0_123, %c0_124] : memref<8x128xf32, #tpu.memory_space<vmem>>, vector<8x128xf32>
      tpu.vector_store %arg11[%c0_123, %c0_124], %455 {strides = array<i32>} : memref<8x128xf32, #tpu.memory_space<vmem>>, vector<8x128xf32>,
    } else {
    }
    %c0 = arith.constant 0 : index
    %c0_1 = arith.constant 0 : index
    %c0_2 = arith.constant 0 : index
    %3 = vector.load %arg2[%c0, %c0_1, %c0_2] : memref<8x8x128xbf16, #tpu.memory_space<vmem>>, vector<8x8x128xbf16>
    %4 = vector.shape_cast %3 : vector<8x8x128xbf16> to vector<64x128xbf16>
    %c0_3 = arith.constant 0 : index
    %c0_4 = arith.constant 0 : index
    %c0_5 = arith.constant 0 : index
    %5 = vector.load %arg3[%c0_3, %c0_4, %c0_5] : memref<1x128x512xbf16, #tpu.memory_space<vmem>>, vector<1x128x512xbf16>
    %6 = vector.shape_cast %5 : vector<1x128x512xbf16> to vector<128x512xbf16>
    %cst = arith.constant dense<0.000000e+00> : vector<64x512xf32>
    %7 = tpu.matmul %4, %6, %cst {dimension_numbers = #tpu.dot_dimension_numbers<[1], [0], [0], [1], [0, 0, 1, 1], [], []>} : vector<64x128xbf16>, vector<128x512xbf16>, vector<64x512xf32> -> vector<64x512xf32>
    %c0_6 = arith.constant 0 : index
    %c0_7 = arith.constant 0 : index
    %c0_8 = arith.constant 0 : index
    %8 = vector.load %arg5[%c0_6, %c0_7, %c0_8] : memref<1x1x512xf32, #tpu.memory_space<vmem>>, vector<1x1x512xf32>
    %9 = vector.shape_cast %8 : vector<1x1x512xf32> to vector<1x512xf32>
    %10 = vector.broadcast %9 : vector<1x512xf32> to vector<64x512xf32>
    %11 = arith.addf %7, %10 : vector<64x512xf32>
    %12 = vector.shape_cast %11 : vector<64x512xf32> to vector<8x8x512xf32>
    %c0_9 = arith.constant 0 : index
    %c0_10 = arith.constant 0 : index
    %c0_11 = arith.constant 0 : index
    %13 = vector.load %arg9[%c0_9, %c0_10, %c0_11] : memref<8x8x512xf32, #tpu.memory_space<vmem>>, vector<8x8x512xf32>
    tpu.vector_store %arg9[%c0_9, %c0_10, %c0_11], %12 {strides = array<i32>} : memref<8x8x512xf32, #tpu.memory_space<vmem>>, vector<8x8x512xf32>,
    %c0_12 = arith.constant 0 : index
    %c0_13 = arith.constant 0 : index
    %c0_14 = arith.constant 0 : index
    %14 = vector.load %arg4[%c0_12, %c0_13, %c0_14] : memref<1x128x512xbf16, #tpu.memory_space<vmem>>, vector<1x128x512xbf16>
    %15 = vector.shape_cast %14 : vector<1x128x512xbf16> to vector<128x512xbf16>
    %c0_15 = arith.constant 0 : index
    %c0_16 = arith.constant 0 : index
    %16 = vector.load %arg6[%c0_15, %c0_16] : memref<8x1xi32, #tpu.memory_space<vmem>>, vector<8x1xi32>
    %c2_i32 = arith.constant 2 : i32
    %17 = arith.muli %c2_i32, %arg1 : i32
    %c0_i32_17 = arith.constant 0 : i32
    %18 = arith.subi %c0_i32_17, %17 : i32
    %19 = arith.muli %arg0, %18 : i32
    %20 = arith.addi %arg1, %19 : i32
    %c8_i32 = arith.constant 8 : i32
    %21 = arith.muli %20, %c8_i32 : i32
    %c0_18 = arith.constant 0 : index
    %c0_19 = arith.constant 0 : index
    %22 = vector.load %arg10[%c0_18, %c0_19] : memref<8x128xf32, #tpu.memory_space<vmem>>, vector<8x128xf32>
    %c0_20 = arith.constant 0 : index
    %c0_21 = arith.constant 0 : index
    %23 = vector.load %arg11[%c0_20, %c0_21] : memref<8x128xf32, #tpu.memory_space<vmem>>, vector<8x128xf32>
    %c0_i32_22 = arith.constant 0 : i32
    %c2_i32_23 = arith.constant 2 : i32
    %24 = arith.muli %c2_i32_23, %c0_i32_22 : i32
    %c7_i32 = arith.constant 7 : i32
    %25 = arith.subi %c7_i32, %24 : i32
    %26 = arith.muli %arg0, %25 : i32
    %27 = arith.addi %c0_i32_22, %26 : i32
    %28 = arith.index_cast %27 : i32 to index
    %c0_24 = arith.constant 0 : index
    %c0_25 = arith.constant 0 : index
    %29 = vector.load %arg9[%28, %c0_24, %c0_25] : memref<8x8x512xf32, #tpu.memory_space<vmem>>, vector<1x8x512xf32>
    %30 = vector.shape_cast %29 : vector<1x8x512xf32> to vector<8x512xf32>
    %31 = arith.truncf %22 : vector<8x128xf32> to vector<8x128xbf16>
    %cst_26 = arith.constant dense<0.000000e+00> : vector<8x512xf32>
    %32 = tpu.matmul %31, %15, %cst_26 {dimension_numbers = #tpu.dot_dimension_numbers<[1], [0], [0], [1], [0, 0, 1, 1], [], []>} : vector<8x128xbf16>, vector<128x512xbf16>, vector<8x512xf32> -> vector<8x512xf32>
    %33 = arith.addf %30, %32 : vector<8x512xf32>
    %34 = vector.extract_strided_slice %33 {offsets = [0, 0], sizes = [8, 128], strides = [1, 1]} : vector<8x512xf32> to vector<8x128xf32>
    %35 = arith.negf %34 : vector<8x128xf32>
    %36 = math.exp %35 : vector<8x128xf32>
    %cst_27 = arith.constant 1.000000e+00 : f32
    %37 = vector.broadcast %cst_27 : f32 to vector<8x128xf32>
    %38 = arith.addf %37, %36 : vector<8x128xf32>
    %39 = arith.divf %37, %38 : vector<8x128xf32>
    %40 = vector.extract_strided_slice %33 {offsets = [0, 128], sizes = [8, 128], strides = [1, 1]} : vector<8x512xf32> to vector<8x128xf32>
    %41 = arith.negf %40 : vector<8x128xf32>
    %42 = math.exp %41 : vector<8x128xf32>
    %cst_28 = arith.constant 1.000000e+00 : f32
    %43 = vector.broadcast %cst_28 : f32 to vector<8x128xf32>
    %44 = arith.addf %43, %42 : vector<8x128xf32>
    %45 = arith.divf %43, %44 : vector<8x128xf32>
    %46 = vector.extract_strided_slice %33 {offsets = [0, 256], sizes = [8, 128], strides = [1, 1]} : vector<8x512xf32> to vector<8x128xf32>
    %47 = math.tanh %46 : vector<8x128xf32>
    %48 = vector.extract_strided_slice %33 {offsets = [0, 384], sizes = [8, 128], strides = [1, 1]} : vector<8x512xf32> to vector<8x128xf32>
    %49 = arith.negf %48 : vector<8x128xf32>
    %50 = math.exp %49 : vector<8x128xf32>
    %cst_29 = arith.constant 1.000000e+00 : f32
    %51 = vector.broadcast %cst_29 : f32 to vector<8x128xf32>
    %52 = arith.addf %51, %50 : vector<8x128xf32>
    %53 = arith.divf %51, %52 : vector<8x128xf32>
    %54 = arith.mulf %45, %23 : vector<8x128xf32>
    %55 = arith.mulf %39, %47 : vector<8x128xf32>
    %56 = arith.addf %54, %55 : vector<8x128xf32>
    %57 = math.tanh %56 : vector<8x128xf32>
    %58 = arith.mulf %53, %57 : vector<8x128xf32>
    %59 = arith.addi %21, %27 : i32
    %60 = vector.broadcast %59 : i32 to vector<8x1xi32>
    %61 = arith.cmpi slt, %60, %16 : vector<8x1xi32>
    %cst_30 = arith.constant 0.000000e+00 : f32
    %62 = vector.shape_cast %61 : vector<8x1xi1> to vector<8x1xi1>
    %63 = vector.broadcast %62 : vector<8x1xi1> to vector<8x128xi1>
    %64 = vector.broadcast %cst_30 : f32 to vector<8x128xf32>
    %65 = arith.select %63, %58, %64 : vector<8x128xi1>, vector<8x128xf32>
    %66 = arith.truncf %65 : vector<8x128xf32> to vector<8x128xbf16>
    %67 = arith.index_cast %27 : i32 to index
    %c0_31 = arith.constant 0 : index
    %c0_32 = arith.constant 0 : index
    %68 = vector.load %arg7[%67, %c0_31, %c0_32] : memref<8x8x128xbf16, #tpu.memory_space<vmem>>, vector<1x8x128xbf16>
    %69 = vector.shape_cast %68 : vector<1x8x128xbf16> to vector<8x128xbf16>
    %70 = vector.shape_cast %66 : vector<8x128xbf16> to vector<1x8x128xbf16>
    tpu.vector_store %arg7[%67, %c0_31, %c0_32], %70 {strides = array<i32>} : memref<8x8x128xbf16, #tpu.memory_space<vmem>>, vector<1x8x128xbf16>,
    %71 = vector.shape_cast %61 : vector<8x1xi1> to vector<8x1xi1>
    %72 = vector.broadcast %71 : vector<8x1xi1> to vector<8x128xi1>
    %73 = arith.select %72, %58, %22 : vector<8x128xi1>, vector<8x128xf32>
    %74 = vector.shape_cast %61 : vector<8x1xi1> to vector<8x1xi1>
    %75 = vector.broadcast %74 : vector<8x1xi1> to vector<8x128xi1>
    %76 = arith.select %75, %56, %23 : vector<8x128xi1>, vector<8x128xf32>
    %c1_i32 = arith.constant 1 : i32
    %c2_i32_33 = arith.constant 2 : i32
    %77 = arith.muli %c2_i32_33, %c1_i32 : i32
    %c7_i32_34 = arith.constant 7 : i32
    %78 = arith.subi %c7_i32_34, %77 : i32
    %79 = arith.muli %arg0, %78 : i32
    %80 = arith.addi %c1_i32, %79 : i32
    %81 = arith.index_cast %80 : i32 to index
    %c0_35 = arith.constant 0 : index
    %c0_36 = arith.constant 0 : index
    %82 = vector.load %arg9[%81, %c0_35, %c0_36] : memref<8x8x512xf32, #tpu.memory_space<vmem>>, vector<1x8x512xf32>
    %83 = vector.shape_cast %82 : vector<1x8x512xf32> to vector<8x512xf32>
    %84 = arith.truncf %73 : vector<8x128xf32> to vector<8x128xbf16>
    %cst_37 = arith.constant dense<0.000000e+00> : vector<8x512xf32>
    %85 = tpu.matmul %84, %15, %cst_37 {dimension_numbers = #tpu.dot_dimension_numbers<[1], [0], [0], [1], [0, 0, 1, 1], [], []>} : vector<8x128xbf16>, vector<128x512xbf16>, vector<8x512xf32> -> vector<8x512xf32>
    %86 = arith.addf %83, %85 : vector<8x512xf32>
    %87 = vector.extract_strided_slice %86 {offsets = [0, 0], sizes = [8, 128], strides = [1, 1]} : vector<8x512xf32> to vector<8x128xf32>
    %88 = arith.negf %87 : vector<8x128xf32>
    %89 = math.exp %88 : vector<8x128xf32>
    %cst_38 = arith.constant 1.000000e+00 : f32
    %90 = vector.broadcast %cst_38 : f32 to vector<8x128xf32>
    %91 = arith.addf %90, %89 : vector<8x128xf32>
    %92 = arith.divf %90, %91 : vector<8x128xf32>
    %93 = vector.extract_strided_slice %86 {offsets = [0, 128], sizes = [8, 128], strides = [1, 1]} : vector<8x512xf32> to vector<8x128xf32>
    %94 = arith.negf %93 : vector<8x128xf32>
    %95 = math.exp %94 : vector<8x128xf32>
    %cst_39 = arith.constant 1.000000e+00 : f32
    %96 = vector.broadcast %cst_39 : f32 to vector<8x128xf32>
    %97 = arith.addf %96, %95 : vector<8x128xf32>
    %98 = arith.divf %96, %97 : vector<8x128xf32>
    %99 = vector.extract_strided_slice %86 {offsets = [0, 256], sizes = [8, 128], strides = [1, 1]} : vector<8x512xf32> to vector<8x128xf32>
    %100 = math.tanh %99 : vector<8x128xf32>
    %101 = vector.extract_strided_slice %86 {offsets = [0, 384], sizes = [8, 128], strides = [1, 1]} : vector<8x512xf32> to vector<8x128xf32>
    %102 = arith.negf %101 : vector<8x128xf32>
    %103 = math.exp %102 : vector<8x128xf32>
    %cst_40 = arith.constant 1.000000e+00 : f32
    %104 = vector.broadcast %cst_40 : f32 to vector<8x128xf32>
    %105 = arith.addf %104, %103 : vector<8x128xf32>
    %106 = arith.divf %104, %105 : vector<8x128xf32>
    %107 = arith.mulf %98, %76 : vector<8x128xf32>
    %108 = arith.mulf %92, %100 : vector<8x128xf32>
    %109 = arith.addf %107, %108 : vector<8x128xf32>
    %110 = math.tanh %109 : vector<8x128xf32>
    %111 = arith.mulf %106, %110 : vector<8x128xf32>
    %112 = arith.addi %21, %80 : i32
    %113 = vector.broadcast %112 : i32 to vector<8x1xi32>
    %114 = arith.cmpi slt, %113, %16 : vector<8x1xi32>
    %cst_41 = arith.constant 0.000000e+00 : f32
    %115 = vector.shape_cast %114 : vector<8x1xi1> to vector<8x1xi1>
    %116 = vector.broadcast %115 : vector<8x1xi1> to vector<8x128xi1>
    %117 = vector.broadcast %cst_41 : f32 to vector<8x128xf32>
    %118 = arith.select %116, %111, %117 : vector<8x128xi1>, vector<8x128xf32>
    %119 = arith.truncf %118 : vector<8x128xf32> to vector<8x128xbf16>
    %120 = arith.index_cast %80 : i32 to index
    %c0_42 = arith.constant 0 : index
    %c0_43 = arith.constant 0 : index
    %121 = vector.load %arg7[%120, %c0_42, %c0_43] : memref<8x8x128xbf16, #tpu.memory_space<vmem>>, vector<1x8x128xbf16>
    %122 = vector.shape_cast %121 : vector<1x8x128xbf16> to vector<8x128xbf16>
    %123 = vector.shape_cast %119 : vector<8x128xbf16> to vector<1x8x128xbf16>
    tpu.vector_store %arg7[%120, %c0_42, %c0_43], %123 {strides = array<i32>} : memref<8x8x128xbf16, #tpu.memory_space<vmem>>, vector<1x8x128xbf16>,
    %124 = vector.shape_cast %114 : vector<8x1xi1> to vector<8x1xi1>
    %125 = vector.broadcast %124 : vector<8x1xi1> to vector<8x128xi1>
    %126 = arith.select %125, %111, %73 : vector<8x128xi1>, vector<8x128xf32>
    %127 = vector.shape_cast %114 : vector<8x1xi1> to vector<8x1xi1>
    %128 = vector.broadcast %127 : vector<8x1xi1> to vector<8x128xi1>
    %129 = arith.select %128, %109, %76 : vector<8x128xi1>, vector<8x128xf32>
    %c2_i32_44 = arith.constant 2 : i32
    %c2_i32_45 = arith.constant 2 : i32
    %130 = arith.muli %c2_i32_45, %c2_i32_44 : i32
    %c7_i32_46 = arith.constant 7 : i32
    %131 = arith.subi %c7_i32_46, %130 : i32
    %132 = arith.muli %arg0, %131 : i32
    %133 = arith.addi %c2_i32_44, %132 : i32
    %134 = arith.index_cast %133 : i32 to index
    %c0_47 = arith.constant 0 : index
    %c0_48 = arith.constant 0 : index
    %135 = vector.load %arg9[%134, %c0_47, %c0_48] : memref<8x8x512xf32, #tpu.memory_space<vmem>>, vector<1x8x512xf32>
    %136 = vector.shape_cast %135 : vector<1x8x512xf32> to vector<8x512xf32>
    %137 = arith.truncf %126 : vector<8x128xf32> to vector<8x128xbf16>
    %cst_49 = arith.constant dense<0.000000e+00> : vector<8x512xf32>
    %138 = tpu.matmul %137, %15, %cst_49 {dimension_numbers = #tpu.dot_dimension_numbers<[1], [0], [0], [1], [0, 0, 1, 1], [], []>} : vector<8x128xbf16>, vector<128x512xbf16>, vector<8x512xf32> -> vector<8x512xf32>
    %139 = arith.addf %136, %138 : vector<8x512xf32>
    %140 = vector.extract_strided_slice %139 {offsets = [0, 0], sizes = [8, 128], strides = [1, 1]} : vector<8x512xf32> to vector<8x128xf32>
    %141 = arith.negf %140 : vector<8x128xf32>
    %142 = math.exp %141 : vector<8x128xf32>
    %cst_50 = arith.constant 1.000000e+00 : f32
    %143 = vector.broadcast %cst_50 : f32 to vector<8x128xf32>
    %144 = arith.addf %143, %142 : vector<8x128xf32>
    %145 = arith.divf %143, %144 : vector<8x128xf32>
    %146 = vector.extract_strided_slice %139 {offsets = [0, 128], sizes = [8, 128], strides = [1, 1]} : vector<8x512xf32> to vector<8x128xf32>
    %147 = arith.negf %146 : vector<8x128xf32>
    %148 = math.exp %147 : vector<8x128xf32>
    %cst_51 = arith.constant 1.000000e+00 : f32
    %149 = vector.broadcast %cst_51 : f32 to vector<8x128xf32>
    %150 = arith.addf %149, %148 : vector<8x128xf32>
    %151 = arith.divf %149, %150 : vector<8x128xf32>
    %152 = vector.extract_strided_slice %139 {offsets = [0, 256], sizes = [8, 128], strides = [1, 1]} : vector<8x512xf32> to vector<8x128xf32>
    %153 = math.tanh %152 : vector<8x128xf32>
    %154 = vector.extract_strided_slice %139 {offsets = [0, 384], sizes = [8, 128], strides = [1, 1]} : vector<8x512xf32> to vector<8x128xf32>
    %155 = arith.negf %154 : vector<8x128xf32>
    %156 = math.exp %155 : vector<8x128xf32>
    %cst_52 = arith.constant 1.000000e+00 : f32
    %157 = vector.broadcast %cst_52 : f32 to vector<8x128xf32>
    %158 = arith.addf %157, %156 : vector<8x128xf32>
    %159 = arith.divf %157, %158 : vector<8x128xf32>
    %160 = arith.mulf %151, %129 : vector<8x128xf32>
    %161 = arith.mulf %145, %153 : vector<8x128xf32>
    %162 = arith.addf %160, %161 : vector<8x128xf32>
    %163 = math.tanh %162 : vector<8x128xf32>
    %164 = arith.mulf %159, %163 : vector<8x128xf32>
    %165 = arith.addi %21, %133 : i32
    %166 = vector.broadcast %165 : i32 to vector<8x1xi32>
    %167 = arith.cmpi slt, %166, %16 : vector<8x1xi32>
    %cst_53 = arith.constant 0.000000e+00 : f32
    %168 = vector.shape_cast %167 : vector<8x1xi1> to vector<8x1xi1>
    %169 = vector.broadcast %168 : vector<8x1xi1> to vector<8x128xi1>
    %170 = vector.broadcast %cst_53 : f32 to vector<8x128xf32>
    %171 = arith.select %169, %164, %170 : vector<8x128xi1>, vector<8x128xf32>
    %172 = arith.truncf %171 : vector<8x128xf32> to vector<8x128xbf16>
    %173 = arith.index_cast %133 : i32 to index
    %c0_54 = arith.constant 0 : index
    %c0_55 = arith.constant 0 : index
    %174 = vector.load %arg7[%173, %c0_54, %c0_55] : memref<8x8x128xbf16, #tpu.memory_space<vmem>>, vector<1x8x128xbf16>
    %175 = vector.shape_cast %174 : vector<1x8x128xbf16> to vector<8x128xbf16>
    %176 = vector.shape_cast %172 : vector<8x128xbf16> to vector<1x8x128xbf16>
    tpu.vector_store %arg7[%173, %c0_54, %c0_55], %176 {strides = array<i32>} : memref<8x8x128xbf16, #tpu.memory_space<vmem>>, vector<1x8x128xbf16>,
    %177 = vector.shape_cast %167 : vector<8x1xi1> to vector<8x1xi1>
    %178 = vector.broadcast %177 : vector<8x1xi1> to vector<8x128xi1>
    %179 = arith.select %178, %164, %126 : vector<8x128xi1>, vector<8x128xf32>
    %180 = vector.shape_cast %167 : vector<8x1xi1> to vector<8x1xi1>
    %181 = vector.broadcast %180 : vector<8x1xi1> to vector<8x128xi1>
    %182 = arith.select %181, %162, %129 : vector<8x128xi1>, vector<8x128xf32>
    %c3_i32 = arith.constant 3 : i32
    %c2_i32_56 = arith.constant 2 : i32
    %183 = arith.muli %c2_i32_56, %c3_i32 : i32
    %c7_i32_57 = arith.constant 7 : i32
    %184 = arith.subi %c7_i32_57, %183 : i32
    %185 = arith.muli %arg0, %184 : i32
    %186 = arith.addi %c3_i32, %185 : i32
    %187 = arith.index_cast %186 : i32 to index
    %c0_58 = arith.constant 0 : index
    %c0_59 = arith.constant 0 : index
    %188 = vector.load %arg9[%187, %c0_58, %c0_59] : memref<8x8x512xf32, #tpu.memory_space<vmem>>, vector<1x8x512xf32>
    %189 = vector.shape_cast %188 : vector<1x8x512xf32> to vector<8x512xf32>
    %190 = arith.truncf %179 : vector<8x128xf32> to vector<8x128xbf16>
    %cst_60 = arith.constant dense<0.000000e+00> : vector<8x512xf32>
    %191 = tpu.matmul %190, %15, %cst_60 {dimension_numbers = #tpu.dot_dimension_numbers<[1], [0], [0], [1], [0, 0, 1, 1], [], []>} : vector<8x128xbf16>, vector<128x512xbf16>, vector<8x512xf32> -> vector<8x512xf32>
    %192 = arith.addf %189, %191 : vector<8x512xf32>
    %193 = vector.extract_strided_slice %192 {offsets = [0, 0], sizes = [8, 128], strides = [1, 1]} : vector<8x512xf32> to vector<8x128xf32>
    %194 = arith.negf %193 : vector<8x128xf32>
    %195 = math.exp %194 : vector<8x128xf32>
    %cst_61 = arith.constant 1.000000e+00 : f32
    %196 = vector.broadcast %cst_61 : f32 to vector<8x128xf32>
    %197 = arith.addf %196, %195 : vector<8x128xf32>
    %198 = arith.divf %196, %197 : vector<8x128xf32>
    %199 = vector.extract_strided_slice %192 {offsets = [0, 128], sizes = [8, 128], strides = [1, 1]} : vector<8x512xf32> to vector<8x128xf32>
    %200 = arith.negf %199 : vector<8x128xf32>
    %201 = math.exp %200 : vector<8x128xf32>
    %cst_62 = arith.constant 1.000000e+00 : f32
    %202 = vector.broadcast %cst_62 : f32 to vector<8x128xf32>
    %203 = arith.addf %202, %201 : vector<8x128xf32>
    %204 = arith.divf %202, %203 : vector<8x128xf32>
    %205 = vector.extract_strided_slice %192 {offsets = [0, 256], sizes = [8, 128], strides = [1, 1]} : vector<8x512xf32> to vector<8x128xf32>
    %206 = math.tanh %205 : vector<8x128xf32>
    %207 = vector.extract_strided_slice %192 {offsets = [0, 384], sizes = [8, 128], strides = [1, 1]} : vector<8x512xf32> to vector<8x128xf32>
    %208 = arith.negf %207 : vector<8x128xf32>
    %209 = math.exp %208 : vector<8x128xf32>
    %cst_63 = arith.constant 1.000000e+00 : f32
    %210 = vector.broadcast %cst_63 : f32 to vector<8x128xf32>
    %211 = arith.addf %210, %209 : vector<8x128xf32>
    %212 = arith.divf %210, %211 : vector<8x128xf32>
    %213 = arith.mulf %204, %182 : vector<8x128xf32>
    %214 = arith.mulf %198, %206 : vector<8x128xf32>
    %215 = arith.addf %213, %214 : vector<8x128xf32>
    %216 = math.tanh %215 : vector<8x128xf32>
    %217 = arith.mulf %212, %216 : vector<8x128xf32>
    %218 = arith.addi %21, %186 : i32
    %219 = vector.broadcast %218 : i32 to vector<8x1xi32>
    %220 = arith.cmpi slt, %219, %16 : vector<8x1xi32>
    %cst_64 = arith.constant 0.000000e+00 : f32
    %221 = vector.shape_cast %220 : vector<8x1xi1> to vector<8x1xi1>
    %222 = vector.broadcast %221 : vector<8x1xi1> to vector<8x128xi1>
    %223 = vector.broadcast %cst_64 : f32 to vector<8x128xf32>
    %224 = arith.select %222, %217, %223 : vector<8x128xi1>, vector<8x128xf32>
    %225 = arith.truncf %224 : vector<8x128xf32> to vector<8x128xbf16>
    %226 = arith.index_cast %186 : i32 to index
    %c0_65 = arith.constant 0 : index
    %c0_66 = arith.constant 0 : index
    %227 = vector.load %arg7[%226, %c0_65, %c0_66] : memref<8x8x128xbf16, #tpu.memory_space<vmem>>, vector<1x8x128xbf16>
    %228 = vector.shape_cast %227 : vector<1x8x128xbf16> to vector<8x128xbf16>
    %229 = vector.shape_cast %225 : vector<8x128xbf16> to vector<1x8x128xbf16>
    tpu.vector_store %arg7[%226, %c0_65, %c0_66], %229 {strides = array<i32>} : memref<8x8x128xbf16, #tpu.memory_space<vmem>>, vector<1x8x128xbf16>,
    %230 = vector.shape_cast %220 : vector<8x1xi1> to vector<8x1xi1>
    %231 = vector.broadcast %230 : vector<8x1xi1> to vector<8x128xi1>
    %232 = arith.select %231, %217, %179 : vector<8x128xi1>, vector<8x128xf32>
    %233 = vector.shape_cast %220 : vector<8x1xi1> to vector<8x1xi1>
    %234 = vector.broadcast %233 : vector<8x1xi1> to vector<8x128xi1>
    %235 = arith.select %234, %215, %182 : vector<8x128xi1>, vector<8x128xf32>
    %c4_i32 = arith.constant 4 : i32
    %c2_i32_67 = arith.constant 2 : i32
    %236 = arith.muli %c2_i32_67, %c4_i32 : i32
    %c7_i32_68 = arith.constant 7 : i32
    %237 = arith.subi %c7_i32_68, %236 : i32
    %238 = arith.muli %arg0, %237 : i32
    %239 = arith.addi %c4_i32, %238 : i32
    %240 = arith.index_cast %239 : i32 to index
    %c0_69 = arith.constant 0 : index
    %c0_70 = arith.constant 0 : index
    %241 = vector.load %arg9[%240, %c0_69, %c0_70] : memref<8x8x512xf32, #tpu.memory_space<vmem>>, vector<1x8x512xf32>
    %242 = vector.shape_cast %241 : vector<1x8x512xf32> to vector<8x512xf32>
    %243 = arith.truncf %232 : vector<8x128xf32> to vector<8x128xbf16>
    %cst_71 = arith.constant dense<0.000000e+00> : vector<8x512xf32>
    %244 = tpu.matmul %243, %15, %cst_71 {dimension_numbers = #tpu.dot_dimension_numbers<[1], [0], [0], [1], [0, 0, 1, 1], [], []>} : vector<8x128xbf16>, vector<128x512xbf16>, vector<8x512xf32> -> vector<8x512xf32>
    %245 = arith.addf %242, %244 : vector<8x512xf32>
    %246 = vector.extract_strided_slice %245 {offsets = [0, 0], sizes = [8, 128], strides = [1, 1]} : vector<8x512xf32> to vector<8x128xf32>
    %247 = arith.negf %246 : vector<8x128xf32>
    %248 = math.exp %247 : vector<8x128xf32>
    %cst_72 = arith.constant 1.000000e+00 : f32
    %249 = vector.broadcast %cst_72 : f32 to vector<8x128xf32>
    %250 = arith.addf %249, %248 : vector<8x128xf32>
    %251 = arith.divf %249, %250 : vector<8x128xf32>
    %252 = vector.extract_strided_slice %245 {offsets = [0, 128], sizes = [8, 128], strides = [1, 1]} : vector<8x512xf32> to vector<8x128xf32>
    %253 = arith.negf %252 : vector<8x128xf32>
    %254 = math.exp %253 : vector<8x128xf32>
    %cst_73 = arith.constant 1.000000e+00 : f32
    %255 = vector.broadcast %cst_73 : f32 to vector<8x128xf32>
    %256 = arith.addf %255, %254 : vector<8x128xf32>
    %257 = arith.divf %255, %256 : vector<8x128xf32>
    %258 = vector.extract_strided_slice %245 {offsets = [0, 256], sizes = [8, 128], strides = [1, 1]} : vector<8x512xf32> to vector<8x128xf32>
    %259 = math.tanh %258 : vector<8x128xf32>
    %260 = vector.extract_strided_slice %245 {offsets = [0, 384], sizes = [8, 128], strides = [1, 1]} : vector<8x512xf32> to vector<8x128xf32>
    %261 = arith.negf %260 : vector<8x128xf32>
    %262 = math.exp %261 : vector<8x128xf32>
    %cst_74 = arith.constant 1.000000e+00 : f32
    %263 = vector.broadcast %cst_74 : f32 to vector<8x128xf32>
    %264 = arith.addf %263, %262 : vector<8x128xf32>
    %265 = arith.divf %263, %264 : vector<8x128xf32>
    %266 = arith.mulf %257, %235 : vector<8x128xf32>
    %267 = arith.mulf %251, %259 : vector<8x128xf32>
    %268 = arith.addf %266, %267 : vector<8x128xf32>
    %269 = math.tanh %268 : vector<8x128xf32>
    %270 = arith.mulf %265, %269 : vector<8x128xf32>
    %271 = arith.addi %21, %239 : i32
    %272 = vector.broadcast %271 : i32 to vector<8x1xi32>
    %273 = arith.cmpi slt, %272, %16 : vector<8x1xi32>
    %cst_75 = arith.constant 0.000000e+00 : f32
    %274 = vector.shape_cast %273 : vector<8x1xi1> to vector<8x1xi1>
    %275 = vector.broadcast %274 : vector<8x1xi1> to vector<8x128xi1>
    %276 = vector.broadcast %cst_75 : f32 to vector<8x128xf32>
    %277 = arith.select %275, %270, %276 : vector<8x128xi1>, vector<8x128xf32>
    %278 = arith.truncf %277 : vector<8x128xf32> to vector<8x128xbf16>
    %279 = arith.index_cast %239 : i32 to index
    %c0_76 = arith.constant 0 : index
    %c0_77 = arith.constant 0 : index
    %280 = vector.load %arg7[%279, %c0_76, %c0_77] : memref<8x8x128xbf16, #tpu.memory_space<vmem>>, vector<1x8x128xbf16>
    %281 = vector.shape_cast %280 : vector<1x8x128xbf16> to vector<8x128xbf16>
    %282 = vector.shape_cast %278 : vector<8x128xbf16> to vector<1x8x128xbf16>
    tpu.vector_store %arg7[%279, %c0_76, %c0_77], %282 {strides = array<i32>} : memref<8x8x128xbf16, #tpu.memory_space<vmem>>, vector<1x8x128xbf16>,
    %283 = vector.shape_cast %273 : vector<8x1xi1> to vector<8x1xi1>
    %284 = vector.broadcast %283 : vector<8x1xi1> to vector<8x128xi1>
    %285 = arith.select %284, %270, %232 : vector<8x128xi1>, vector<8x128xf32>
    %286 = vector.shape_cast %273 : vector<8x1xi1> to vector<8x1xi1>
    %287 = vector.broadcast %286 : vector<8x1xi1> to vector<8x128xi1>
    %288 = arith.select %287, %268, %235 : vector<8x128xi1>, vector<8x128xf32>
    %c5_i32 = arith.constant 5 : i32
    %c2_i32_78 = arith.constant 2 : i32
    %289 = arith.muli %c2_i32_78, %c5_i32 : i32
    %c7_i32_79 = arith.constant 7 : i32
    %290 = arith.subi %c7_i32_79, %289 : i32
    %291 = arith.muli %arg0, %290 : i32
    %292 = arith.addi %c5_i32, %291 : i32
    %293 = arith.index_cast %292 : i32 to index
    %c0_80 = arith.constant 0 : index
    %c0_81 = arith.constant 0 : index
    %294 = vector.load %arg9[%293, %c0_80, %c0_81] : memref<8x8x512xf32, #tpu.memory_space<vmem>>, vector<1x8x512xf32>
    %295 = vector.shape_cast %294 : vector<1x8x512xf32> to vector<8x512xf32>
    %296 = arith.truncf %285 : vector<8x128xf32> to vector<8x128xbf16>
    %cst_82 = arith.constant dense<0.000000e+00> : vector<8x512xf32>
    %297 = tpu.matmul %296, %15, %cst_82 {dimension_numbers = #tpu.dot_dimension_numbers<[1], [0], [0], [1], [0, 0, 1, 1], [], []>} : vector<8x128xbf16>, vector<128x512xbf16>, vector<8x512xf32> -> vector<8x512xf32>
    %298 = arith.addf %295, %297 : vector<8x512xf32>
    %299 = vector.extract_strided_slice %298 {offsets = [0, 0], sizes = [8, 128], strides = [1, 1]} : vector<8x512xf32> to vector<8x128xf32>
    %300 = arith.negf %299 : vector<8x128xf32>
    %301 = math.exp %300 : vector<8x128xf32>
    %cst_83 = arith.constant 1.000000e+00 : f32
    %302 = vector.broadcast %cst_83 : f32 to vector<8x128xf32>
    %303 = arith.addf %302, %301 : vector<8x128xf32>
    %304 = arith.divf %302, %303 : vector<8x128xf32>
    %305 = vector.extract_strided_slice %298 {offsets = [0, 128], sizes = [8, 128], strides = [1, 1]} : vector<8x512xf32> to vector<8x128xf32>
    %306 = arith.negf %305 : vector<8x128xf32>
    %307 = math.exp %306 : vector<8x128xf32>
    %cst_84 = arith.constant 1.000000e+00 : f32
    %308 = vector.broadcast %cst_84 : f32 to vector<8x128xf32>
    %309 = arith.addf %308, %307 : vector<8x128xf32>
    %310 = arith.divf %308, %309 : vector<8x128xf32>
    %311 = vector.extract_strided_slice %298 {offsets = [0, 256], sizes = [8, 128], strides = [1, 1]} : vector<8x512xf32> to vector<8x128xf32>
    %312 = math.tanh %311 : vector<8x128xf32>
    %313 = vector.extract_strided_slice %298 {offsets = [0, 384], sizes = [8, 128], strides = [1, 1]} : vector<8x512xf32> to vector<8x128xf32>
    %314 = arith.negf %313 : vector<8x128xf32>
    %315 = math.exp %314 : vector<8x128xf32>
    %cst_85 = arith.constant 1.000000e+00 : f32
    %316 = vector.broadcast %cst_85 : f32 to vector<8x128xf32>
    %317 = arith.addf %316, %315 : vector<8x128xf32>
    %318 = arith.divf %316, %317 : vector<8x128xf32>
    %319 = arith.mulf %310, %288 : vector<8x128xf32>
    %320 = arith.mulf %304, %312 : vector<8x128xf32>
    %321 = arith.addf %319, %320 : vector<8x128xf32>
    %322 = math.tanh %321 : vector<8x128xf32>
    %323 = arith.mulf %318, %322 : vector<8x128xf32>
    %324 = arith.addi %21, %292 : i32
    %325 = vector.broadcast %324 : i32 to vector<8x1xi32>
    %326 = arith.cmpi slt, %325, %16 : vector<8x1xi32>
    %cst_86 = arith.constant 0.000000e+00 : f32
    %327 = vector.shape_cast %326 : vector<8x1xi1> to vector<8x1xi1>
    %328 = vector.broadcast %327 : vector<8x1xi1> to vector<8x128xi1>
    %329 = vector.broadcast %cst_86 : f32 to vector<8x128xf32>
    %330 = arith.select %328, %323, %329 : vector<8x128xi1>, vector<8x128xf32>
    %331 = arith.truncf %330 : vector<8x128xf32> to vector<8x128xbf16>
    %332 = arith.index_cast %292 : i32 to index
    %c0_87 = arith.constant 0 : index
    %c0_88 = arith.constant 0 : index
    %333 = vector.load %arg7[%332, %c0_87, %c0_88] : memref<8x8x128xbf16, #tpu.memory_space<vmem>>, vector<1x8x128xbf16>
    %334 = vector.shape_cast %333 : vector<1x8x128xbf16> to vector<8x128xbf16>
    %335 = vector.shape_cast %331 : vector<8x128xbf16> to vector<1x8x128xbf16>
    tpu.vector_store %arg7[%332, %c0_87, %c0_88], %335 {strides = array<i32>} : memref<8x8x128xbf16, #tpu.memory_space<vmem>>, vector<1x8x128xbf16>,
    %336 = vector.shape_cast %326 : vector<8x1xi1> to vector<8x1xi1>
    %337 = vector.broadcast %336 : vector<8x1xi1> to vector<8x128xi1>
    %338 = arith.select %337, %323, %285 : vector<8x128xi1>, vector<8x128xf32>
    %339 = vector.shape_cast %326 : vector<8x1xi1> to vector<8x1xi1>
    %340 = vector.broadcast %339 : vector<8x1xi1> to vector<8x128xi1>
    %341 = arith.select %340, %321, %288 : vector<8x128xi1>, vector<8x128xf32>
    %c6_i32 = arith.constant 6 : i32
    %c2_i32_89 = arith.constant 2 : i32
    %342 = arith.muli %c2_i32_89, %c6_i32 : i32
    %c7_i32_90 = arith.constant 7 : i32
    %343 = arith.subi %c7_i32_90, %342 : i32
    %344 = arith.muli %arg0, %343 : i32
    %345 = arith.addi %c6_i32, %344 : i32
    %346 = arith.index_cast %345 : i32 to index
    %c0_91 = arith.constant 0 : index
    %c0_92 = arith.constant 0 : index
    %347 = vector.load %arg9[%346, %c0_91, %c0_92] : memref<8x8x512xf32, #tpu.memory_space<vmem>>, vector<1x8x512xf32>
    %348 = vector.shape_cast %347 : vector<1x8x512xf32> to vector<8x512xf32>
    %349 = arith.truncf %338 : vector<8x128xf32> to vector<8x128xbf16>
    %cst_93 = arith.constant dense<0.000000e+00> : vector<8x512xf32>
    %350 = tpu.matmul %349, %15, %cst_93 {dimension_numbers = #tpu.dot_dimension_numbers<[1], [0], [0], [1], [0, 0, 1, 1], [], []>} : vector<8x128xbf16>, vector<128x512xbf16>, vector<8x512xf32> -> vector<8x512xf32>
    %351 = arith.addf %348, %350 : vector<8x512xf32>
    %352 = vector.extract_strided_slice %351 {offsets = [0, 0], sizes = [8, 128], strides = [1, 1]} : vector<8x512xf32> to vector<8x128xf32>
    %353 = arith.negf %352 : vector<8x128xf32>
    %354 = math.exp %353 : vector<8x128xf32>
    %cst_94 = arith.constant 1.000000e+00 : f32
    %355 = vector.broadcast %cst_94 : f32 to vector<8x128xf32>
    %356 = arith.addf %355, %354 : vector<8x128xf32>
    %357 = arith.divf %355, %356 : vector<8x128xf32>
    %358 = vector.extract_strided_slice %351 {offsets = [0, 128], sizes = [8, 128], strides = [1, 1]} : vector<8x512xf32> to vector<8x128xf32>
    %359 = arith.negf %358 : vector<8x128xf32>
    %360 = math.exp %359 : vector<8x128xf32>
    %cst_95 = arith.constant 1.000000e+00 : f32
    %361 = vector.broadcast %cst_95 : f32 to vector<8x128xf32>
    %362 = arith.addf %361, %360 : vector<8x128xf32>
    %363 = arith.divf %361, %362 : vector<8x128xf32>
    %364 = vector.extract_strided_slice %351 {offsets = [0, 256], sizes = [8, 128], strides = [1, 1]} : vector<8x512xf32> to vector<8x128xf32>
    %365 = math.tanh %364 : vector<8x128xf32>
    %366 = vector.extract_strided_slice %351 {offsets = [0, 384], sizes = [8, 128], strides = [1, 1]} : vector<8x512xf32> to vector<8x128xf32>
    %367 = arith.negf %366 : vector<8x128xf32>
    %368 = math.exp %367 : vector<8x128xf32>
    %cst_96 = arith.constant 1.000000e+00 : f32
    %369 = vector.broadcast %cst_96 : f32 to vector<8x128xf32>
    %370 = arith.addf %369, %368 : vector<8x128xf32>
    %371 = arith.divf %369, %370 : vector<8x128xf32>
    %372 = arith.mulf %363, %341 : vector<8x128xf32>
    %373 = arith.mulf %357, %365 : vector<8x128xf32>
    %374 = arith.addf %372, %373 : vector<8x128xf32>
    %375 = math.tanh %374 : vector<8x128xf32>
    %376 = arith.mulf %371, %375 : vector<8x128xf32>
    %377 = arith.addi %21, %345 : i32
    %378 = vector.broadcast %377 : i32 to vector<8x1xi32>
    %379 = arith.cmpi slt, %378, %16 : vector<8x1xi32>
    %cst_97 = arith.constant 0.000000e+00 : f32
    %380 = vector.shape_cast %379 : vector<8x1xi1> to vector<8x1xi1>
    %381 = vector.broadcast %380 : vector<8x1xi1> to vector<8x128xi1>
    %382 = vector.broadcast %cst_97 : f32 to vector<8x128xf32>
    %383 = arith.select %381, %376, %382 : vector<8x128xi1>, vector<8x128xf32>
    %384 = arith.truncf %383 : vector<8x128xf32> to vector<8x128xbf16>
    %385 = arith.index_cast %345 : i32 to index
    %c0_98 = arith.constant 0 : index
    %c0_99 = arith.constant 0 : index
    %386 = vector.load %arg7[%385, %c0_98, %c0_99] : memref<8x8x128xbf16, #tpu.memory_space<vmem>>, vector<1x8x128xbf16>
    %387 = vector.shape_cast %386 : vector<1x8x128xbf16> to vector<8x128xbf16>
    %388 = vector.shape_cast %384 : vector<8x128xbf16> to vector<1x8x128xbf16>
    tpu.vector_store %arg7[%385, %c0_98, %c0_99], %388 {strides = array<i32>} : memref<8x8x128xbf16, #tpu.memory_space<vmem>>, vector<1x8x128xbf16>,
    %389 = vector.shape_cast %379 : vector<8x1xi1> to vector<8x1xi1>
    %390 = vector.broadcast %389 : vector<8x1xi1> to vector<8x128xi1>
    %391 = arith.select %390, %376, %338 : vector<8x128xi1>, vector<8x128xf32>
    %392 = vector.shape_cast %379 : vector<8x1xi1> to vector<8x1xi1>
    %393 = vector.broadcast %392 : vector<8x1xi1> to vector<8x128xi1>
    %394 = arith.select %393, %374, %341 : vector<8x128xi1>, vector<8x128xf32>
    %c7_i32_100 = arith.constant 7 : i32
    %c2_i32_101 = arith.constant 2 : i32
    %395 = arith.muli %c2_i32_101, %c7_i32_100 : i32
    %c7_i32_102 = arith.constant 7 : i32
    %396 = arith.subi %c7_i32_102, %395 : i32
    %397 = arith.muli %arg0, %396 : i32
    %398 = arith.addi %c7_i32_100, %397 : i32
    %399 = arith.index_cast %398 : i32 to index
    %c0_103 = arith.constant 0 : index
    %c0_104 = arith.constant 0 : index
    %400 = vector.load %arg9[%399, %c0_103, %c0_104] : memref<8x8x512xf32, #tpu.memory_space<vmem>>, vector<1x8x512xf32>
    %401 = vector.shape_cast %400 : vector<1x8x512xf32> to vector<8x512xf32>
    %402 = arith.truncf %391 : vector<8x128xf32> to vector<8x128xbf16>
    %cst_105 = arith.constant dense<0.000000e+00> : vector<8x512xf32>
    %403 = tpu.matmul %402, %15, %cst_105 {dimension_numbers = #tpu.dot_dimension_numbers<[1], [0], [0], [1], [0, 0, 1, 1], [], []>} : vector<8x128xbf16>, vector<128x512xbf16>, vector<8x512xf32> -> vector<8x512xf32>
    %404 = arith.addf %401, %403 : vector<8x512xf32>
    %405 = vector.extract_strided_slice %404 {offsets = [0, 0], sizes = [8, 128], strides = [1, 1]} : vector<8x512xf32> to vector<8x128xf32>
    %406 = arith.negf %405 : vector<8x128xf32>
    %407 = math.exp %406 : vector<8x128xf32>
    %cst_106 = arith.constant 1.000000e+00 : f32
    %408 = vector.broadcast %cst_106 : f32 to vector<8x128xf32>
    %409 = arith.addf %408, %407 : vector<8x128xf32>
    %410 = arith.divf %408, %409 : vector<8x128xf32>
    %411 = vector.extract_strided_slice %404 {offsets = [0, 128], sizes = [8, 128], strides = [1, 1]} : vector<8x512xf32> to vector<8x128xf32>
    %412 = arith.negf %411 : vector<8x128xf32>
    %413 = math.exp %412 : vector<8x128xf32>
    %cst_107 = arith.constant 1.000000e+00 : f32
    %414 = vector.broadcast %cst_107 : f32 to vector<8x128xf32>
    %415 = arith.addf %414, %413 : vector<8x128xf32>
    %416 = arith.divf %414, %415 : vector<8x128xf32>
    %417 = vector.extract_strided_slice %404 {offsets = [0, 256], sizes = [8, 128], strides = [1, 1]} : vector<8x512xf32> to vector<8x128xf32>
    %418 = math.tanh %417 : vector<8x128xf32>
    %419 = vector.extract_strided_slice %404 {offsets = [0, 384], sizes = [8, 128], strides = [1, 1]} : vector<8x512xf32> to vector<8x128xf32>
    %420 = arith.negf %419 : vector<8x128xf32>
    %421 = math.exp %420 : vector<8x128xf32>
    %cst_108 = arith.constant 1.000000e+00 : f32
    %422 = vector.broadcast %cst_108 : f32 to vector<8x128xf32>
    %423 = arith.addf %422, %421 : vector<8x128xf32>
    %424 = arith.divf %422, %423 : vector<8x128xf32>
    %425 = arith.mulf %416, %394 : vector<8x128xf32>
    %426 = arith.mulf %410, %418 : vector<8x128xf32>
    %427 = arith.addf %425, %426 : vector<8x128xf32>
    %428 = math.tanh %427 : vector<8x128xf32>
    %429 = arith.mulf %424, %428 : vector<8x128xf32>
    %430 = arith.addi %21, %398 : i32
    %431 = vector.broadcast %430 : i32 to vector<8x1xi32>
    %432 = arith.cmpi slt, %431, %16 : vector<8x1xi32>
    %cst_109 = arith.constant 0.000000e+00 : f32
    %433 = vector.shape_cast %432 : vector<8x1xi1> to vector<8x1xi1>
    %434 = vector.broadcast %433 : vector<8x1xi1> to vector<8x128xi1>
    %435 = vector.broadcast %cst_109 : f32 to vector<8x128xf32>
    %436 = arith.select %434, %429, %435 : vector<8x128xi1>, vector<8x128xf32>
    %437 = arith.truncf %436 : vector<8x128xf32> to vector<8x128xbf16>
    %438 = arith.index_cast %398 : i32 to index
    %c0_110 = arith.constant 0 : index
    %c0_111 = arith.constant 0 : index
    %439 = vector.load %arg7[%438, %c0_110, %c0_111] : memref<8x8x128xbf16, #tpu.memory_space<vmem>>, vector<1x8x128xbf16>
    %440 = vector.shape_cast %439 : vector<1x8x128xbf16> to vector<8x128xbf16>
    %441 = vector.shape_cast %437 : vector<8x128xbf16> to vector<1x8x128xbf16>
    tpu.vector_store %arg7[%438, %c0_110, %c0_111], %441 {strides = array<i32>} : memref<8x8x128xbf16, #tpu.memory_space<vmem>>, vector<1x8x128xbf16>,
    %442 = vector.shape_cast %432 : vector<8x1xi1> to vector<8x1xi1>
    %443 = vector.broadcast %442 : vector<8x1xi1> to vector<8x128xi1>
    %444 = arith.select %443, %429, %391 : vector<8x128xi1>, vector<8x128xf32>
    %445 = vector.shape_cast %432 : vector<8x1xi1> to vector<8x1xi1>
    %446 = vector.broadcast %445 : vector<8x1xi1> to vector<8x128xi1>
    %447 = arith.select %446, %427, %394 : vector<8x128xi1>, vector<8x128xf32>
    %c8_i32_112 = arith.constant 8 : i32
    %c0_113 = arith.constant 0 : index
    %c0_114 = arith.constant 0 : index
    %448 = vector.load %arg10[%c0_113, %c0_114] : memref<8x128xf32, #tpu.memory_space<vmem>>, vector<8x128xf32>
    tpu.vector_store %arg10[%c0_113, %c0_114], %444 {strides = array<i32>} : memref<8x128xf32, #tpu.memory_space<vmem>>, vector<8x128xf32>,
    %c0_115 = arith.constant 0 : index
    %c0_116 = arith.constant 0 : index
    %449 = vector.load %arg11[%c0_115, %c0_116] : memref<8x128xf32, #tpu.memory_space<vmem>>, vector<8x128xf32>
    tpu.vector_store %arg11[%c0_115, %c0_116], %447 {strides = array<i32>} : memref<8x128xf32, #tpu.memory_space<vmem>>, vector<8x128xf32>,
    %c0_i32_117 = arith.constant 0 : i32
    %450 = arith.cmpi eq, %arg1, %c0_i32_117 : i32
    %451 = arith.extui %450 : i1 to i32
    %c0_i32_118 = arith.constant 0 : i32
    %452 = arith.cmpi ne, %451, %c0_i32_118 : i32
    scf.if %452 {
      %c0_119 = arith.constant 0 : index
      %c0_120 = arith.constant 0 : index
      %c0_121 = arith.constant 0 : index
      %453 = vector.load %arg8[%c0_119, %c0_120, %c0_121] : memref<1x8x128xf32, #tpu.memory_space<vmem>>, vector<1x8x128xf32>
      %454 = vector.shape_cast %453 : vector<1x8x128xf32> to vector<8x128xf32>
      %455 = vector.shape_cast %444 : vector<8x128xf32> to vector<1x8x128xf32>
      tpu.vector_store %arg8[%c0_119, %c0_120, %c0_121], %455 {strides = array<i32>} : memref<1x8x128xf32, #tpu.memory_space<vmem>>, vector<1x8x128xf32>,
    } else {
    }
    return
  }
  func.func @transform_0(%arg0: i32, %arg1: i32) -> (i32, i32, i32) {
    %c2_i32 = arith.constant 2 : i32
    %0 = arith.muli %c2_i32, %arg1 : i32
    %c0_i32 = arith.constant 0 : i32
    %1 = arith.subi %c0_i32, %0 : i32
    %2 = arith.muli %arg0, %1 : i32
    %3 = arith.addi %arg1, %2 : i32
    %c0_i32_0 = arith.constant 0 : i32
    %c0_i32_1 = arith.constant 0 : i32
    %c0_i32_2 = arith.constant 0 : i32
    return %3, %c0_i32_0, %c0_i32_1 : i32, i32, i32
  }
  func.func @transform_1(%arg0: i32, %arg1: i32) -> (i32, i32, i32) {
    %c0_i32 = arith.constant 0 : i32
    %c0_i32_0 = arith.constant 0 : i32
    %c0_i32_1 = arith.constant 0 : i32
    return %arg0, %c0_i32, %c0_i32_0 : i32, i32, i32
  }
  func.func @transform_2(%arg0: i32, %arg1: i32) -> (i32, i32, i32) {
    %c0_i32 = arith.constant 0 : i32
    %c0_i32_0 = arith.constant 0 : i32
    %c0_i32_1 = arith.constant 0 : i32
    return %arg0, %c0_i32, %c0_i32_0 : i32, i32, i32
  }
  func.func @transform_3(%arg0: i32, %arg1: i32) -> (i32, i32, i32) {
    %c0_i32 = arith.constant 0 : i32
    %c0_i32_0 = arith.constant 0 : i32
    %c0_i32_1 = arith.constant 0 : i32
    return %arg0, %c0_i32, %c0_i32_0 : i32, i32, i32
  }
  func.func @transform_4(%arg0: i32, %arg1: i32) -> (i32, i32) {
    %c0_i32 = arith.constant 0 : i32
    %c0_i32_0 = arith.constant 0 : i32
    %c0_i32_1 = arith.constant 0 : i32
    return %c0_i32, %c0_i32_0 : i32, i32
  }
  func.func @transform_5(%arg0: i32, %arg1: i32) -> (i32, i32, i32) {
    %c2_i32 = arith.constant 2 : i32
    %0 = arith.muli %c2_i32, %arg1 : i32
    %c0_i32 = arith.constant 0 : i32
    %1 = arith.subi %c0_i32, %0 : i32
    %2 = arith.muli %arg0, %1 : i32
    %3 = arith.addi %arg1, %2 : i32
    %c0_i32_0 = arith.constant 0 : i32
    %c0_i32_1 = arith.constant 0 : i32
    return %3, %c0_i32_0, %arg0 : i32, i32, i32
  }
  func.func @transform_6(%arg0: i32, %arg1: i32) -> (i32, i32, i32) {
    %c0_i32 = arith.constant 0 : i32
    %c0_i32_0 = arith.constant 0 : i32
    %c0_i32_1 = arith.constant 0 : i32
    return %arg0, %c0_i32, %c0_i32_0 : i32, i32, i32
  }
}

</mosaic_0001>

<bundles_post_ra>
// kernel: tpu_custom_call.1
= control target key start
LH: loop header
LB: loop body
LE: loop exit
PB: predicated region body
PF: predicated region fallthrough
CT: control target
= control target key end

     0   :  { %s4167_s0 = inlined_call_operand.hbm [shape: bf16[8,8,128], index: 0, kind: input, shape index: {}]   ;;  %s4168_s1 = inlined_call_operand.hbm [shape: bf16[2,128,512], index: 1, kind: input, shape index: {}]   ;;  %s4169_s2 = inlined_call_operand.hbm [shape: bf16[2,128,512], index: 2, kind: input, shape index: {}]   ;;  %s4170_s3 = inlined_call_operand.vmem [shape: f32[2,1,512], index: 3, kind: input, shape index: {}]   ;;  %s4171_s4 = inlined_call_operand.vmem [shape: s32[8,1], index: 4, kind: input, shape index: {}]   ;;  %s4172_s5 = inlined_call_operand.hbm [shape: bf16[8,8,256], index: 5, kind: output, shape index: {0}]   ;;  %s4173_s6 = inlined_call_operand.hbm [shape: f32[2,8,128], index: 6, kind: output, shape index: {1}]  }
   0x1   :  { %4188 = sst [smem:[#allocation22_spill]] %s4168_s1 }
   0x2   :  { %12 = vsyncpa [#allocation6], 0 }
   0x3   :  { %14 = vsyncpa [#allocation6 + $0x1], 0 }
   0x4   :  { %15 = vsyncpa [#allocation9], 0 }
   0x5   :  { %17 = vsyncpa [#allocation9 + $0x1], 0 }
   0x6   :  { %18 = vsyncpa [#allocation7], 0 }
   0x7   :  { %20 = vsyncpa [#allocation7 + $0x1], 0 }
   0x8   :  { %21 = vsyncpa [#allocation13], 0 }
   0x9   :  { %23 = vsyncpa [#allocation13 + $0x1], 0  ;;  %s3182_s21 = smov 0   ;;  %s3184_s22 = smov 0  }
   0xa   :  { %s3186_s23 = smov 0   ;;  %s3188_s24 = smov 0  }
   0xb   :  { %s3190_s25 = smov 0   ;;  %s3192_s26 = smov 0  }
   0xc LB: > { %4189 = sst [smem:[#allocation18_spill]] %s3119_s23  ;;  %s3213_s27 = sadd.s32 4294967295, %s3131_s26   ;;  %s3131_s26 = sphi %s3192_s26, %s29_s26   ;;  %s3127_s25 = sphi %s3190_s25, %s4219_s25   ;;  %s3123_s24 = sphi %s3188_s24, %s4218_s24   ;;  %s3119_s23 = sphi %s3186_s23, %s4217_s23   ;;  %s3115_s22 = sphi %s3184_s22, %s4221_s22   ;;  %s3111_s21 = sphi %s3182_s21, %s4220_s21  }
   0xd   : > { %4190 = sst [smem:[#allocation19_spill]] %s3127_s25  ;;  %s2398_s28 = sadd.s32 4294967294, %s3131_s26  }
   0xe   : > { %s41_s29 = sadd.s32 1, %s3127_s25  ;;  %s82_s30 = sadd.s32 1, %s3119_s23 }
   0xf   : > { %p43_p0 = scmp.ge.s32.totalorder %s41_s29, 2  ;;  %p89_p1 = scmp.ne.s32.totalorder %s3119_s23, %s3115_s22 }
  0x10   : > { %p4177_p2 = scmp.eq.s32.totalorder %s3131_s26, 0  ;;  %p95_p3 = scmp.ne.s32.totalorder %s3115_s22, %s3111_s21 }
  0x11   : > { %s4223_s29 = smov (%p43_p0, %s41_s29), 0  ;;  %p4175_p5 = scmp.eq.s32.totalorder %s3213_s27, 0 }
  0x12   : > { %4191 = sst [smem:[#allocation20_spill]] %s4223_s29  ;;  %p3227_p4 = por %p4177_p2, %p89_p1 }
  0x13   : > { %s79_s8 = ssub.s32 %s3127_s25, %s4223_s29  ;;  %p202_p6 = scmp.eq.s32.totalorder %s3213_s27, 1 }
  0x14   : > { %p80_p7 = scmp.eq.s32.totalorder %s79_s8, 0  ;;  %p3237_p8 = por %p4175_p5, %p95_p3 }
  0x15   : > { %p3241_p9 = por %p202_p6, %p89_p1  ;;  %p208_p10 = scmp.eq.s32.totalorder %s2398_s28, 1 }
  0x16   : > { %s4193_s9 = scalar_select %p3237_p8, 1, 0 }
  0x17   : > { %s4194_s10 = scalar_select %p3241_p9, 1, 0 }
  0x18   : > { %s3246_s11 = scalar_select %p80_p7, %s3119_s23, %s82_s30  }
  0x19   : > { %p3248_p11 = por %p208_p10, %p95_p3  ;;  %p4176_p13 = scmp.lt.s32.totalorder %s3131_s26, 2 }
  0x1a   : > { %4195 = sst [smem:[#allocation21_spill]] %s3246_s11  ;;  %s282_s13 = sand.u32 1, %s3131_s26  }
  0x1b   : > { %s4196_s12 = scalar_select %p3248_p11, 1, 0 }
  0x1c   : > { %s284_s14 = sand.u32 1, %s3119_s23   ;;  %s4174_s16 = sshll.u32 %s3127_s25, 12 }
  0x1d   : > { %s3256_s15 = sshll.u32 %s284_s14, 8  ;;  %s4197_s1 = sld [smem:[#allocation22_spill]] }
  0x1e   : > { %s286_s20 = scalar_lea.vmem [#allocation8], %s3256_s15  ;;  %p3273_p0 = pnand %p4176_p13, %p3227_p4 }
  0x1f   : > { %s293_s28 = sshll.u32 %s286_s20, 4  ;;  %s3277_s8 = scalar_lea.sflag [#allocation9], %s282_s13  ;;  %s3267_s28 = int_to_ptr.vmem [resolvable:$true] %s293_s28 }
  0x20   : > { %s4198_s30 = scalar_select %p3273_p0, 1, 0 }
  0x21   : > { %p4182_p3 = pneg %p3273_p0 }
  0x23   : > { %s3264_s19 = scalar_lea.hbm %s4197_s1, %s4174_s16  ;;  %s2930_s7 = scalar_lea.hbm %s4197_s1, 8192 }
  0x24   : > { %s2925_s14 = scalar_lea.hbm %s3264_s19, 4096  ;;  %p2931_p4 = scmp.lt.u32.totalorder %s3264_s19, %s4197_s1 }
  0x25   : > { %p2926_p1 = scmp.ne.s32.totalorder %s3264_s19, %s2925_s14  ;;  %p2932_p10 = scmp.lt.u32.totalorder %s2930_s7, %s2925_s14 }
  0x26   : > { %p2934_p5 = scmp.lt.u32.totalorder %s2925_s14, %s3264_s19 }
  0x27   : > { %p2928_p6 = pnand %p4182_p3, %p2926_p1  ;;  %p2933_p12 = por %p2932_p10, %p2931_p4 }
  0x29   : > { %p2929_p7 = pneg %p2928_p6  ;;  %p2935_p13 = por %p2934_p5, %p2933_p12 }
  0x2b   : > { %p2936_p2 = pnand %p2935_p13, %p2929_p7 }
  0x2d   : > { %2939 = shalt.err (!%p2936_p2)
}
  0x2e   : > { %s2940_s13 = scalar_lea.vmem %s3267_s28, 4096  ;;  %s3133_s17 = smov [#allocation8]  }
  0x2f   : > { %p2941_p1 = scmp.ne.s32.totalorder %s3267_s28, %s2940_s13  ;;  %s2945_s18 = sshll.u32 %s3133_s17, 4  ;;  %s2946_s18 = int_to_ptr.vmem [resolvable:$false] %s2945_s18 }
  0x30   : > { %s2947_s16 = scalar_lea.vmem %s2946_s18, 8192  ;;  %p2948_p9 = scmp.lt.s32.totalorder %s3267_s28, %s2946_s18 }
  0x31   : > { %p2943_p6 = pnand %p2941_p1, %p4182_p3  ;;  %p2949_p4 = scmp.lt.s32.totalorder %s2947_s16, %s2940_s13 }
  0x33   : > { %p2944_p11 = pneg %p2943_p6  ;;  %p2950_p10 = por %p2949_p4, %p2948_p9 }
  0x35   : > { %p2951_p5 = pnand %p2950_p10, %p2944_p11 }
  0x37   : > { %2954 = shalt.err (!%p2951_p5)
}
  0x38   : > { %s4181_s14 = smov 256   ;;  %s4186_s7 = smov 16  }
  0x39   : > { %2590 = dma.hbm_to_vmem [thread:$0]  (!%p3273_p0), %s3264_s19, 4096, %s3267_s28, %s3277_s8, %s4181_s14, %s4181_s14, %s4186_s7  }
  0x3a   : > { %s4199_s20 = sshll.u32 %s3127_s25, 12  ;;  %s307_s16 = scalar_lea.vmem [#allocation10], %s3256_s15 }
  0x3b   : > { %s3313_s18 = scalar_lea.hbm %s4169_s2, %s4199_s20  ;;  %s314_s1 = sshll.u32 %s307_s16, 4  ;;  %s3316_s1 = int_to_ptr.vmem [resolvable:$true] %s314_s1 }
  0x3c   : > { %p2408_p2 = scmp.ge.s32.totalorder %s3131_s26, 1  ;;  %p329_p9 = scmp.lt.s32.totalorder %s3131_s26, 3 }
  0x3d   : > { %s3136_s11 = smov [#allocation5]   ;;  %p4201_p12 = scmp.eq.s32.totalorder %s3131_s26, 0 }
  0x3e   : > { %p3320_p11 = pnand %p2408_p2, %p329_p9  ;;  %s272_s23 = sshll.u32 %s3136_s11, 4  ;;  %s273_s23 = int_to_ptr.vmem [resolvable:$true] %s272_s23 }
  0x3f   : > { %p4202_p13 = scmp.lt.s32.totalorder %s3131_s26, 2  ;;  %s2955_s20 = scalar_lea.hbm %s4167_s0, 512 }
  0x40   : > { %s4200_s29 = scalar_select %p3320_p11, 1, 0 }
  0x41   : > { %p3328_p7 = pnand %p4202_p13, %p4201_p12  ;;  %p2956_p1 = scmp.ne.s32.totalorder %s4167_s0, %s2955_s20 }
  0x42   : > { %p2962_p5 = scmp.lt.u32.totalorder %s2955_s20, %s4167_s0 }
  0x43   : > { %p2957_p6 = pneg %p3328_p7 }
  0x45   : > { %p2958_p4 = pnand %p2957_p6, %p2956_p1 }
  0x47   : > { %p2959_p10 = pneg %p2958_p4 }
  0x49   : > { %p2964_p2 = pnand %p2962_p5, %p2959_p10 }
  0x4b   : > { %2967 = shalt.err (!%p2964_p2)
}
  0x4c   : > { %s2968_s14 = scalar_lea.vmem %s273_s23, 512  ;;  %s2975_s28 = scalar_lea.vmem %s273_s23, 1024 }
  0x4d   : > { %p2969_p9 = scmp.ne.s32.totalorder %s273_s23, %s2968_s14  ;;  %p2976_p3 = scmp.lt.s32.totalorder %s273_s23, %s273_s23 }
  0x4e   : > { %p2977_p8 = scmp.lt.s32.totalorder %s2975_s28, %s2968_s14 }
  0x4f   : > { %p2971_p12 = pnand %p2969_p9, %p2957_p6 }
  0x50   : > { %p2978_p11 = por %p2977_p8, %p2976_p3 }
  0x51   : > { %p2972_p13 = pneg %p2971_p12 }
  0x53   : > { %p2979_p0 = pnand %p2978_p11, %p2972_p13 }
  0x55   : > { %2982 = shalt.err (!%p2979_p0)
}
  0x56   : > { %s3137_s15 = smov 64   ;;  %s3138_s20 = smov 4  }
  0x57   : > { %2587 = dma.hbm_to_vmem [thread:$0]  (!%p3328_p7), %s4167_s0, 512, %s273_s23, [#allocation6], %s3137_s15, %s3137_s15, %s3138_s20  }
  0x58   : > { %s2983_s11 = scalar_lea.hbm %s3313_s18, 4096  ;;  %p4204_p6 = scmp.ne.s32.totalorder %s4198_s30, 0 }
  0x59   : > { %p2984_p1 = scmp.ne.s32.totalorder %s3313_s18, %s2983_s11  ;;  %s2988_s28 = scalar_lea.hbm %s4169_s2, 8192 }
  0x5a   : > { %p4205_p4 = pneg %p4204_p6  ;;  %p2989_p0 = scmp.lt.u32.totalorder %s3313_s18, %s4169_s2 }
  0x5b   : > { %p2990_p11 = scmp.lt.u32.totalorder %s2988_s28, %s2983_s11  ;;  %p2992_p5 = scmp.lt.u32.totalorder %s2983_s11, %s3313_s18 }
  0x5c   : > { %p2986_p8 = pnand %p2984_p1, %p4205_p4 }
  0x5d   : > { %p2991_p10 = por %p2990_p11, %p2989_p0 }
  0x5e   : > { %p2987_p3 = pneg %p2986_p8 }
  0x5f   : > { %p2993_p2 = por %p2992_p5, %p2991_p10 }
  0x61   : > { %p2994_p9 = pnand %p2993_p2, %p2987_p3 }
  0x63   : > { %2997 = shalt.err (!%p2994_p9)
}
  0x64   : > { %s2998_s23 = scalar_lea.vmem %s3316_s1, 4096  ;;  %p4206_p12 = pmov %p4205_p4 }
  0x65   : > { %p2999_p7 = scmp.ne.s32.totalorder %s3316_s1, %s2998_s23  ;;  %s3139_s19 = smov [#allocation10]  }
  0x66   : > { %s3003_s15 = sshll.u32 %s3139_s19, 4  ;;  %s3004_s15 = int_to_ptr.vmem [resolvable:$false] %s3003_s15 }
  0x67   : > { %p3001_p13 = pnand %p2999_p7, %p4206_p12  ;;  %s3005_s25 = scalar_lea.vmem %s3004_s15, 8192 }
  0x68   : > { %p3006_p4 = scmp.lt.s32.totalorder %s3316_s1, %s3004_s15  ;;  %p3007_p8 = scmp.lt.s32.totalorder %s3005_s25, %s2998_s23 }
  0x69   : > { %p3002_p1 = pneg %p3001_p13 }
  0x6a   : > { %p3008_p0 = por %p3007_p8, %p3006_p4 }
  0x6c   : > { %p3009_p11 = pnand %p3008_p0, %p3002_p1 }
  0x6e   : > { %3012 = shalt.err (!%p3009_p11)
}
  0x6f   : > { %s4207_s7 = smov 16   ;;  %s4208_s20 = smov 256  }
  0x70   : > { %2593 = dma.hbm_to_vmem [thread:$0]  (!%p4204_p6), %s3313_s18, 4096, %s3316_s1, %s3277_s8, %s4208_s20, %s4208_s20, %s4207_s7  }
  0x71   : > { %p4209_p3 = scmp.ne.s32.totalorder %s4200_s29, 0 }
  0x72   : > { %p4210_p10 = scmp.eq.s32.totalorder (!%p4209_p3), %s3213_s27, 0 }
  0x73   : > { %333 = sbr.rel (%p4209_p3) target bundleno = 2324 (0x914), region = 40 }
  0x7a   : > { %3094 = dma.done.wait (%p4210_p10), [#allocation6], 512   ;;  %p4211_p5 = pmov %p4210_p10 }
  0x7b   : > { %s344_s30 = sand.u32 1, %s3213_s27   ;;  %s3383_s13 = sand.u32 1, %s3115_s22  }
  0x7c   : > { %3096 = vsyncadd (%p4211_p5), [#allocation6], 4294966784  ;;  %s2410_s17 = sshll.u32 %s3383_s13, 8  ;;  %s345_s11 = scalar_lea.sflag [#allocation9], %s344_s30 }
  0x7d   : > { %s3388_s1 = scalar_lea.vmem [#allocation8], %s2410_s17  ;;  %p4212_p6 = scmp.ne.s32.totalorder %s4193_s9, 0 }
  0x7f   : > { %3098 = dma.done.wait (%p4212_p6), %s345_s11, 8192  }
  0x80   : > { %3100 = vsyncadd (%p4212_p6), %s345_s11, 4294959104  ;;  %v3140_v0 = vmov 0   ;;  %v2665_v1 = vld [vmem:[%s3388_s1 + $0x4] ss:$16 sps:$4 sm:$0xff]   ;;  %v2667_v2 = vld [vmem:[%s3388_s1 + $0xc] ss:$16 sps:$4 sm:$0xff]  }
  0x81   : > { %704 = vmatprep.mubr.bf16.mxu0 %v3140_v0  ;;  %777 = vmatprep.mubr.bf16.mxu1 %v3140_v0  ;;  %v2669_v3 = vld [vmem:[%s3388_s1] ss:$16 sps:$4 sm:$0xff]   ;;  %v2670_v4 = vld [vmem:[%s3388_s1 + $0x8] ss:$16 sps:$4 sm:$0xff]   ;;  %v2671_v5 = vld [vmem:[%s3388_s1 + $0x24] ss:$16 sps:$4 sm:$0xff]  }
  0x82   : > { %2663 = vset.pattern.permute.xlu0 %v3140_v0  ;;  %2664 = vset.pattern.permute.xlu1 %v3140_v0  ;;  %v2673_v6 = vld [vmem:[%s3388_s1 + $0x2c] ss:$16 sps:$4 sm:$0xff]   ;;  %v2675_v7 = vld [vmem:[%s3388_s1 + $0x20] ss:$16 sps:$4 sm:$0xff]   ;;  %v2676_v8 = vld [vmem:[%s3388_s1 + $0x28] ss:$16 sps:$4 sm:$0xff]  }
  0x83   : > { %672 = vmatprep.subr.bf16.mxu0 %v2665_v1  ;;  %745 = vmatprep.subr.bf16.mxu1 %v2667_v2  ;;  %v2677_v9 = vld [vmem:[%s3388_s1 + $0x44] ss:$16 sps:$4 sm:$0xff]   ;;  %v2679_v10 = vld [vmem:[%s3388_s1 + $0x4c] ss:$16 sps:$4 sm:$0xff]   ;;  %v2681_v11 = vld [vmem:[%s3388_s1 + $0x40] ss:$16 sps:$4 sm:$0xff]  }
  0x84   : > { %673 = vmatpush1.bf16.msra.mxu0 %v2669_v3  ;;  %746 = vmatpush1.bf16.msra.mxu1 %v2670_v4  ;;  %v2682_v12 = vld [vmem:[%s3388_s1 + $0x48] ss:$16 sps:$4 sm:$0xff]   ;;  %v2683_v13 = vld [vmem:[%s3388_s1 + $0x64] ss:$16 sps:$4 sm:$0xff]   ;;  %v2685_v14 = vld [vmem:[%s3388_s1 + $0x6c] ss:$16 sps:$4 sm:$0xff]  }
  0x85   : > { %674 = vmatprep.subr.bf16.mxu0 %v2671_v5  ;;  %747 = vmatprep.subr.bf16.mxu1 %v2673_v6  ;;  %v2687_v15 = vld [vmem:[%s3388_s1 + $0x60] ss:$16 sps:$4 sm:$0xff]   ;;  %v2688_v16 = vld [vmem:[%s3388_s1 + $0x68] ss:$16 sps:$4 sm:$0xff]   ;;  %v2689_v17 = vld [vmem:[%s3388_s1 + $0x84] ss:$16 sps:$4 sm:$0xff]  }
  0x86   : > { %v2691_v18 = vld [vmem:[%s3388_s1 + $0x8c] ss:$16 sps:$4 sm:$0xff]   ;;  %v2693_v19 = vld [vmem:[%s3388_s1 + $0x80] ss:$16 sps:$4 sm:$0xff]   ;;  %v2694_v20 = vld [vmem:[%s3388_s1 + $0x88] ss:$16 sps:$4 sm:$0xff]  }
  0x87   : > { %v2695_v21 = vld [vmem:[%s3388_s1 + $0xa4] ss:$16 sps:$4 sm:$0xff]   ;;  %v2697_v22 = vld [vmem:[%s3388_s1 + $0xac] ss:$16 sps:$4 sm:$0xff]   ;;  %v2699_v23 = vld [vmem:[%s3388_s1 + $0xa0] ss:$16 sps:$4 sm:$0xff]  }
  0x88   : > { %675 = vmatpush1.bf16.msra.mxu0 %v2675_v7  ;;  %748 = vmatpush1.bf16.msra.mxu1 %v2676_v8  ;;  %v2700_v24 = vld [vmem:[%s3388_s1 + $0xa8] ss:$16 sps:$4 sm:$0xff]   ;;  %v2701_v25 = vld [vmem:[%s3388_s1 + $0xc4] ss:$16 sps:$4 sm:$0xff]   ;;  %v2703_v26 = vld [vmem:[%s3388_s1 + $0xcc] ss:$16 sps:$4 sm:$0xff]  }
  0x89   : > { %676 = vmatprep.subr.bf16.mxu0 %v2677_v9  ;;  %749 = vmatprep.subr.bf16.mxu1 %v2679_v10  ;;  %s3426_s27 = scalar_lea.vmem [#allocation10], %s2410_s17  ;;  %v2705_v27 = vld [vmem:[%s3388_s1 + $0xc0] ss:$16 sps:$4 sm:$0xff]   ;;  %v2706_v28 = vld [vmem:[%s3388_s1 + $0xc8] ss:$16 sps:$4 sm:$0xff]   ;;  %s1184_s29 = smul.u32 5, %s3123_s24 }
  0x8a   : > { %v2707_v29 = vld [vmem:[%s3388_s1 + $0xe4] ss:$16 sps:$4 sm:$0xff]   ;;  %v2709_v30 = vld [vmem:[%s3388_s1 + $0xec] ss:$16 sps:$4 sm:$0xff]   ;;  %v2711_v31 = vld [vmem:[%s3388_s1 + $0xe0] ss:$16 sps:$4 sm:$0xff]  }
  0x8b   : > { %v2712_v32 = vld [vmem:[%s3388_s1 + $0xe8] ss:$16 sps:$4 sm:$0xff]   ;;  %v3435_v33 = vld [vmem:[%s3426_s27 + $0x4] ss:$16 sps:$4 sm:$0xff]   ;;  %v3438_v34 = vld [vmem:[%s3426_s27 + $0xc] ss:$16 sps:$4 sm:$0xff]  }
  0x8c   : > { %677 = vmatpush1.bf16.msra.mxu0 %v2681_v11  ;;  %750 = vmatpush1.bf16.msra.mxu1 %v2682_v12  ;;  %v2713_v35 = vld [vmem:[#allocation5] sm:$0xff]   ;;  %v3444_v37 = vld [vmem:[%s3426_s27 + $0x8] ss:$16 sps:$4 sm:$0xff]   ;;  %v3452_v39 = vld [vmem:[%s3426_s27 + $0x2c] ss:$16 sps:$4 sm:$0xff]   ;;  %s890_s9 = smul.u32 7, %s3123_s24 }
  0x8d   : > { %678 = vmatprep.subr.bf16.mxu0 %v2683_v13  ;;  %751 = vmatprep.subr.bf16.mxu1 %v2685_v14  ;;  %v3441_v36 = vld [vmem:[%s3426_s27] ss:$16 sps:$4 sm:$0xff]   ;;  %v3449_v38 = vld [vmem:[%s3426_s27 + $0x24] ss:$16 sps:$4 sm:$0xff]   ;;  %v3463_v42 = vld [vmem:[%s3426_s27 + $0x28] ss:$16 sps:$4 sm:$0xff]  }
  0x8e   : > { %v3455_v40 = vld [vmem:[%s3426_s27 + $0x20] ss:$16 sps:$4 sm:$0xff]   ;;  %v3458_v41 = vld [vmem:[%s3426_s27 + $0x44] ss:$16 sps:$4 sm:$0xff]   ;;  %v3468_v43 = vld [vmem:[%s3426_s27 + $0x4c] ss:$16 sps:$4 sm:$0xff]   ;;  %v1170_v52 = vstv %s890_s9 }
  0x8f   : > { %v2723_v44 = vld [vmem:[#allocation5 + $0x8] sm:$0xff]   ;;  %v3474_v45 = vld [vmem:[%s3426_s27 + $0x40] ss:$16 sps:$4 sm:$0xff]   ;;  %v3485_v47 = vld [vmem:[%s3426_s27 + $0x64] ss:$16 sps:$4 sm:$0xff]   ;;  %s1185_s8 = sadd.s32 1, %s1184_s29 }
  0x90   : > { %679 = vmatpush1.bf16.msra.mxu0 %v2687_v15  ;;  %752 = vmatpush1.bf16.msra.mxu1 %v2688_v16  ;;  %v3479_v46 = vld [vmem:[%s3426_s27 + $0x48] ss:$16 sps:$4 sm:$0xff]   ;;  %v3488_v48 = vld [vmem:[%s3426_s27 + $0x6c] ss:$16 sps:$4 sm:$0xff]   ;;  %v3491_v49 = vld [vmem:[%s3426_s27 + $0x60] ss:$16 sps:$4 sm:$0xff]   ;;  %v1305_v55 = vstv %s1185_s8  ;;  %v468_v16 = vlaneseq }
  0x91   : > { %680 = vmatprep.subr.bf16.mxu0 %v2689_v17  ;;  %753 = vmatprep.subr.bf16.mxu1 %v2691_v18  ;;  %v3496_v50 = vld [vmem:[%s3426_s27 + $0x84] ss:$16 sps:$4 sm:$0xff]   ;;  %v3499_v51 = vld [vmem:[%s3426_s27 + $0x68] ss:$16 sps:$4 sm:$0xff]   ;;  %v3504_v53 = vld [vmem:[%s3426_s27 + $0x8c] ss:$16 sps:$4 sm:$0xff]  }
  0x92   : > { %v3511_v54 = vld [vmem:[%s4171_s4] sm:$0xff]  ;;  %v2736_v56 = vld [vmem:[#allocation5 + $0x10] sm:$0xff]   ;;  %v3520_v58 = vld [vmem:[%s3426_s27 + $0x88] ss:$16 sps:$4 sm:$0xff]   ;;  %s3533_s16 = ssub.s32 4, %s3123_s24  ;;  %s1857_s28 = smul.u32 4294967291, %s3123_s24 }
  0x93   : > { %vm1171_vm0 = vcmp.lt.s32.totalorder %v1170_v52, %v3511_v54  ;;  %v3517_v57 = vld [vmem:[%s3426_s27 + $0x80] ss:$16 sps:$4 sm:$0xff]   ;;  %v3526_v60 = vld [vmem:[%s3426_s27 + $0xa4] ss:$16 sps:$4 sm:$0xff]   ;;  %vm1306_vm1 = vcmp.lt.s32.totalorder %v1305_v55, %v3511_v54  ;;  %v3530_v61 = vld [vmem:[%s3426_s27 + $0xac] ss:$16 sps:$4 sm:$0xff]   ;;  %v1708_v4 = vstv %s3533_s16 }
  0x94   : > { %681 = vmatpush1.bf16.msra.mxu0 %v2693_v19  ;;  %754 = vmatpush1.bf16.msra.mxu1 %v2694_v20  ;;  %v1172_v59 = vsel %vm1171_vm0, 1, %v3140_v0  ;;  %v3538_v62 = vld [vmem:[%s3426_s27 + $0xa0] ss:$16 sps:$4 sm:$0xff]   ;;  %v3541_v63 = vld [vmem:[%s3426_s27 + $0xa8] ss:$16 sps:$4 sm:$0xff]   ;;  %v1307_v1 = vsel %vm1306_vm1, 1, %v3140_v0  ;;  %vm1709_vm2 = vcmp.lt.s32.totalorder %v1708_v4, %v3511_v54 }
  0x95   : > { %682 = vmatprep.subr.bf16.mxu0 %v2695_v21  ;;  %755 = vmatprep.subr.bf16.mxu1 %v2697_v22  ;;  %v3548_v2 = vld [vmem:[%s3426_s27 + $0xc4] ss:$16 sps:$4 sm:$0xff]   ;;  %v3551_v3 = vld [vmem:[%s3426_s27 + $0xcc] ss:$16 sps:$4 sm:$0xff]   ;;  %v3559_v6 = vld [vmem:[%s3426_s27 + $0xc0] ss:$16 sps:$4 sm:$0xff]  }
  0x96   : > { %1174 = vperm.xlu0 %2663, %v1172_v59   ;;  %v2749_v5 = vld [vmem:[#allocation5 + $0x18] sm:$0xff]   ;;  %s1858_s23 = sadd.s32 6, %s1857_s28  ;;  %v3567_v8 = vld [vmem:[%s3426_s27 + $0xe4] ss:$16 sps:$4 sm:$0xff]   ;;  %v3576_v11 = vld [vmem:[%s3426_s27 + $0xe0] ss:$16 sps:$4 sm:$0xff]  }
  0x97   : > { %v3562_v7 = vld [vmem:[%s3426_s27 + $0xc8] ss:$16 sps:$4 sm:$0xff]   ;;  %v3571_v9 = vld [vmem:[%s3426_s27 + $0xec] ss:$16 sps:$4 sm:$0xff]   ;;  %v1978_v10 = vstv %s1858_s23  ;;  %v1710_v13 = vsel %vm1709_vm2, 1, %v3140_v0  ;;  %v3141_v15 = vmov 0.0|0.0  }
  0x98   : > { %683 = vmatpush1.bf16.msra.mxu0 %v2699_v23  ;;  %756 = vmatpush1.bf16.msra.mxu1 %v2700_v24  ;;  %v3579_v12 = vld [vmem:[%s3426_s27 + $0xe8] ss:$16 sps:$4 sm:$0xff]   ;;  %vm1979_vm3 = vcmp.lt.s32.totalorder %v1978_v10, %v3511_v54  ;;  %p410_p2 = scmp.lt.s32.totalorder %s3123_s24, 1  ;;  %v469_v17 = vshrl.u32 %v468_v16, 7  ;;  %s2563_s30 = smul.u32 224, %s3123_s24 }
  0x99   : > { %684 = vmatprep.subr.bf16.mxu0 %v2701_v25  ;;  %757 = vmatprep.subr.bf16.mxu1 %v2703_v26  ;;  %v1980_v14 = vsel %vm1979_vm3, 1, %v3140_v0  ;;  %s2412_s11 = sshll.u32 %s3383_s13, 5  ;;  %s2564_s1 = smul.u32 28, %s3123_s24 }
  0x9a   : > { %1309 = vperm.xlu0 %2663, %v1307_v1   ;;  %s411_s19 = scalar_select %p410_p2, %s3123_s24, 1  ;;  %v470_v18 = vsub.s32 0, %v469_v17  ;;  %v478_v19 = vsub.s32 2, %v469_v17  ;;  %v474_v21 = vsub.s32 1, %v469_v17  ;;  %v482_v22 = vsub.s32 3, %v469_v17 }
  0x9b   : > { %s893_s17 = scalar_lea.vmem [#allocation2], %s2563_s30  ;;  %s3683_s29 = scalar_lea.vmem [#allocation11], %s2412_s11 }
  0x9c   : > { %685 = vmatpush1.bf16.msra.mxu0 %v2705_v27  ;;  %758 = vmatpush1.bf16.msra.mxu1 %v2706_v28  ;;  %s2414_s15 = sshll.u32 %s411_s19, 2  ;;  %s1180_s9 = scalar_lea.vmem %s3683_s29, %s2564_s1 [#allocation11] }
  0x9d   : > { %686 = vmatprep.subr.bf16.mxu0 %v2707_v29  ;;  %759 = vmatprep.subr.bf16.mxu1 %v2709_v30  ;;  %s413_s20 = scalar_lea.vmem %s4170_s3, %s2414_s15  ;;  %s1319_s8 = smul.u32 3, %s3123_s24 }
  0x9e   : > { %1712 = vperm.xlu0 %2663, %v1710_v13   ;;  %v466_v20 = vld [vmem:[%s413_s20] sm:$0xf]  ;;  %s1454_s18 = sadd.s32 3, %s3123_s24  ;;  %s1722_s14 = smul.u32 4294967293, %s3123_s24 }
  0x9f   : > { %v3631_v23 = vrot.slane %v466_v20, %v470_v18  ;;  %v3633_v24 = vrot.slane %v466_v20, %v478_v19  ;;  %v3635_v25 = vrot.slane %v466_v20, %v474_v21  ;;  %v3637_v26 = vrot.slane %v466_v20, %v482_v22  ;;  %s1320_s28 = sadd.s32 2, %s1319_s8  ;;  %s1992_s23 = smul.u32 4294967289, %s3123_s24 }
  0xa0   : > { %687 = vmatpush1.bf16.msra.mxu0 %v2711_v31  ;;  %760 = vmatpush1.bf16.msra.mxu1 %v2712_v32  ;;  %s1723_s19 = sadd.s32 5, %s1722_s14  ;;  %s2489_s25 = smul.u32 160, %s3123_s24 }
  0xa1   : > { %1059 = vmatprep.subr.bf16.mxu0 %v3435_v33  ;;  %1100 = vmatprep.subr.bf16.mxu1 %v3438_v34  ;;  %s1993_s15 = sadd.s32 7, %s1992_s23  ;;  %s2497_s20 = smul.u32 20, %s3123_s24 }
  0xa2   : > { %1982 = vperm.xlu0 %2663, %v1980_v14   ;;  %s2265_s7 = scalar_lea.vmem [#allocation2], %s2489_s25  ;;  %s2507_s1 = smul.u32 12, %s3123_s24 }
  0xa3   : > { %705 = vmatmul.mubr.bf16.vlgmr.msra.gmra.mrb[0].mxu0 %v2713_v35  ;;  %778 = vmatmul.mubr.bf16.vlgmr.msra.gmra.mrb[0].mxu1 %v2713_v35  ;;  %s2269_s30 = scalar_lea.vmem %s3683_s29, %s2497_s20 [#allocation11]  ;;  %s2509_s8 = sshll.u32 %s3123_s24, 5 }
  0xa4   : > { %1060 = vmatpush1.bf16.msra.mxu0 %v3441_v36  ;;  %1101 = vmatpush1.bf16.msra.mxu1 %v3444_v37  ;;  %s2517_s14 = sshll.u32 %s3123_s24, 2  ;;  %s2565_s23 = sshll.u32 %s3533_s16, 5 }
  0xa5   : > { %1061 = vmatprep.subr.bf16.mxu0 %v3449_v38  ;;  %714 = vmatprep.mubr.bf16.mxu0 %v3140_v0  ;;  %p4213_p7 = scmp.ne.s32.totalorder %s4194_s10, 0 }
  0xa6   : > { %787 = vmatprep.mubr.bf16.mxu1 %v3140_v0  ;;  %1102 = vmatprep.subr.bf16.mxu1 %v3452_v39 }
  0xa8   : > { %1062 = vmatpush1.bf16.msra.mxu0 %v3455_v40  ;;  %1103 = vmatpush1.bf16.msra.mxu1 %v3463_v42 }
  0xa9   : > { %1063 = vmatprep.subr.bf16.mxu0 %v3458_v41  ;;  %1104 = vmatprep.subr.bf16.mxu1 %v3468_v43 }
  0xab   : > { %715 = vmatmul.mubr.bf16.gmra.mrb[4].mxu0 %v2723_v44  ;;  %788 = vmatmul.mubr.bf16.gmra.mrb[4].mxu1 %v2723_v44 }
  0xac   : > { %1064 = vmatpush1.bf16.msra.mxu0 %v3474_v45  ;;  %1105 = vmatpush1.bf16.msra.mxu1 %v3479_v46 }
  0xad   : > { %1065 = vmatprep.subr.bf16.mxu0 %v3485_v47  ;;  %724 = vmatprep.mubr.bf16.mxu0 %v3140_v0 }
  0xae   : > { %797 = vmatprep.mubr.bf16.mxu1 %v3140_v0  ;;  %1106 = vmatprep.subr.bf16.mxu1 %v3488_v48 }
  0xb0   : > { %1066 = vmatpush1.bf16.msra.mxu0 %v3491_v49  ;;  %1107 = vmatpush1.bf16.msra.mxu1 %v3499_v51 }
  0xb1   : > { %1067 = vmatprep.subr.bf16.mxu0 %v3496_v50  ;;  %1108 = vmatprep.subr.bf16.mxu1 %v3504_v53 }
  0xb3   : > { %725 = vmatmul.mubr.bf16.gmra.mrb[8].mxu0 %v2736_v56  ;;  %798 = vmatmul.mubr.bf16.gmra.mrb[8].mxu1 %v2736_v56 }
  0xb4   : > { %1068 = vmatpush1.bf16.msra.mxu0 %v3517_v57  ;;  %1109 = vmatpush1.bf16.msra.mxu1 %v3520_v58 }
  0xb5   : > { %1069 = vmatprep.subr.bf16.mxu0 %v3526_v60  ;;  %734 = vmatprep.mubr.bf16.mxu0 %v3140_v0 }
  0xb6   : > { %807 = vmatprep.mubr.bf16.mxu1 %v3140_v0  ;;  %1110 = vmatprep.subr.bf16.mxu1 %v3530_v61 }
  0xb8   : > { %1070 = vmatpush1.bf16.msra.mxu0 %v3538_v62  ;;  %1111 = vmatpush1.bf16.msra.mxu1 %v3541_v63 }
  0xb9   : > { %1071 = vmatprep.subr.bf16.mxu0 %v3548_v2  ;;  %1112 = vmatprep.subr.bf16.mxu1 %v3551_v3 }
  0xbb   : > { %735 = vmatmul.mubr.bf16.gmra.mrb[12].mxu0 %v2749_v5  ;;  %808 = vmatmul.mubr.bf16.gmra.mrb[12].mxu1 %v2749_v5 }
  0xbc   : > { %1072 = vmatpush1.bf16.msra.mxu0 %v3559_v6  ;;  %1113 = vmatpush1.bf16.msra.mxu1 %v3562_v7 }
  0xbd   : > { %1073 = vmatprep.subr.bf16.mxu0 %v3567_v8  ;;  %1091 = vmatprep.mubr.bf16.mxu0 %v3140_v0 }
  0xbe   : > { %1114 = vmatprep.subr.bf16.mxu1 %v3571_v9  ;;  %1132 = vmatprep.mubr.bf16.mxu1 %v3140_v0 }
  0xc0   : > { %1074 = vmatpush1.bf16.msra.mxu0 %v3576_v11  ;;  %1115 = vmatpush1.bf16.msra.mxu1 %v3579_v12 }
  0xc1   : > { %1194 = vmatprep.subr.bf16.mxu0 %v3435_v33  ;;  %1235 = vmatprep.subr.bf16.mxu1 %v3438_v34 }
  0xc3   : > { %1092 = vmatmul.mubr.bf16.vlgmr.msra.gmra.mrb[16].mxu0 %v3141_v15  ;;  %1133 = vmatmul.mubr.bf16.vlgmr.msra.gmra.mrb[16].mxu1 %v3141_v15 }
  0xc4   : > { %1195 = vmatpush1.bf16.msra.mxu0 %v3441_v36  ;;  %1236 = vmatpush1.bf16.msra.mxu1 %v3444_v37 }
  0xc5   : > { %1196 = vmatprep.subr.bf16.mxu0 %v3449_v38  ;;  %1237 = vmatprep.subr.bf16.mxu1 %v3452_v39 }
  0xc6   : > { %1226 = vmatprep.mubr.bf16.mxu0 %v3140_v0  ;;  %1267 = vmatprep.mubr.bf16.mxu1 %v3140_v0 }
  0xc8   : > { %1197 = vmatpush1.bf16.msra.mxu0 %v3455_v40  ;;  %1238 = vmatpush1.bf16.msra.mxu1 %v3463_v42 }
  0xc9   : > { %1198 = vmatprep.subr.bf16.mxu0 %v3458_v41  ;;  %1239 = vmatprep.subr.bf16.mxu1 %v3468_v43 }
  0xcc   : > { %1199 = vmatpush1.bf16.msra.mxu0 %v3474_v45  ;;  %1240 = vmatpush1.bf16.msra.mxu1 %v3479_v46 }
  0xcd   : > { %1200 = vmatprep.subr.bf16.mxu0 %v3485_v47  ;;  %1241 = vmatprep.subr.bf16.mxu1 %v3488_v48 }
  0xd0   : > { %1201 = vmatpush1.bf16.msra.mxu0 %v3491_v49  ;;  %1242 = vmatpush1.bf16.msra.mxu1 %v3499_v51 }
  0xd1   : > { %1202 = vmatprep.subr.bf16.mxu0 %v3496_v50  ;;  %1243 = vmatprep.subr.bf16.mxu1 %v3504_v53 }
  0xd4   : > { %1203 = vmatpush1.bf16.msra.mxu0 %v3517_v57  ;;  %1244 = vmatpush1.bf16.msra.mxu1 %v3520_v58 }
  0xd5   : > { %1204 = vmatprep.subr.bf16.mxu0 %v3526_v60  ;;  %1245 = vmatprep.subr.bf16.mxu1 %v3530_v61 }
  0xd8   : > { %1205 = vmatpush1.bf16.msra.mxu0 %v3538_v62  ;;  %1246 = vmatpush1.bf16.msra.mxu1 %v3541_v63 }
  0xd9   : > { %1206 = vmatprep.subr.bf16.mxu0 %v3548_v2  ;;  %1247 = vmatprep.subr.bf16.mxu1 %v3551_v3 }
  0xdc   : > { %1207 = vmatpush1.bf16.msra.mxu0 %v3559_v6  ;;  %1248 = vmatpush1.bf16.msra.mxu1 %v3562_v7 }
  0xdd   : > { %1208 = vmatprep.subr.bf16.mxu0 %v3567_v8  ;;  %1249 = vmatprep.subr.bf16.mxu1 %v3571_v9 }
  0xe0   : > { %1209 = vmatpush1.bf16.msra.mxu0 %v3576_v11  ;;  %1250 = vmatpush1.bf16.msra.mxu1 %v3579_v12 }
  0xe1   : > { %1329 = vmatprep.subr.bf16.mxu0 %v3435_v33  ;;  %1370 = vmatprep.subr.bf16.mxu1 %v3438_v34 }
 0x176   : > { %v706_v27 = vpop.f32.mrb[0].mxu0  ;;  %v779_v28 = vpop.f32.mrb[0].mxu1 }
 0x177   : > { %v707_v29 = vadd.f32 %v706_v27, %v3631_v23  ;;  %v780_v30 = vadd.f32 %v779_v28, %v3633_v24  ;;  %v708_v31 = vpop.f32.mrb[1].mxu0  ;;  %v781_v32 = vpop.f32.mrb[1].mxu1 }
 0x178   : > { %v709_v35 = vadd.f32 %v708_v31, %v3635_v25  ;;  %v782_v44 = vadd.f32 %v781_v32, %v3637_v26  ;;  %v710_v52 = vpop.f32.mrb[2].mxu0  ;;  %v783_v55 = vpop.f32.mrb[2].mxu1 }
 0x179   : > { %818 = vst [vmem:[#allocation2] sm:$0xff] %v707_v29  ;;  %820 = vst [vmem:[#allocation2 + $0x10] sm:$0xff] %v780_v30  ;;  %v711_v56 = vadd.f32 %v710_v52, %v3631_v23  ;;  %v784_v59 = vadd.f32 %v783_v55, %v3633_v24  ;;  %v712_v1 = vpop.f32.mrb[3].mxu0  ;;  %v785_v4 = vpop.f32.mrb[3].mxu1 }
 0x17a   : > { %819 = vst [vmem:[#allocation2 + $0x8] sm:$0xff] %v709_v35  ;;  %821 = vst [vmem:[#allocation2 + $0x18] sm:$0xff] %v782_v44  ;;  %v713_v5 = vadd.f32 %v712_v1, %v3635_v25  ;;  %v786_v10 = vadd.f32 %v785_v4, %v3637_v26 }
 0x17b   : > { %822 = vst [vmem:[#allocation2 + $0x20] sm:$0xff] %v711_v56  ;;  %824 = vst [vmem:[#allocation2 + $0x30] sm:$0xff] %v784_v59 }
 0x17c   : > { %823 = vst [vmem:[#allocation2 + $0x28] sm:$0xff] %v713_v5  ;;  %825 = vst [vmem:[#allocation2 + $0x38] sm:$0xff] %v786_v10 }
 0x17e   : > { %v716_v13 = vpop.f32.mrb[4].mxu0  ;;  %v789_v14 = vpop.f32.mrb[4].mxu1 }
 0x17f   : > { %v717_v15 = vadd.f32 %v716_v13, %v3631_v23  ;;  %v790_v16 = vadd.f32 %v789_v14, %v3633_v24  ;;  %v718_v17 = vpop.f32.mrb[5].mxu0  ;;  %v791_v18 = vpop.f32.mrb[5].mxu1 }
 0x180   : > { %v719_v19 = vadd.f32 %v718_v17, %v3635_v25  ;;  %v792_v20 = vadd.f32 %v791_v18, %v3637_v26  ;;  %v720_v21 = vpop.f32.mrb[6].mxu0  ;;  %v793_v22 = vpop.f32.mrb[6].mxu1 }
 0x181   : > { %826 = vst [vmem:[#allocation2 + $0x40] sm:$0xff] %v717_v15  ;;  %828 = vst [vmem:[#allocation2 + $0x50] sm:$0xff] %v790_v16  ;;  %v721_v27 = vadd.f32 %v720_v21, %v3631_v23  ;;  %v794_v28 = vadd.f32 %v793_v22, %v3633_v24  ;;  %v722_v29 = vpop.f32.mrb[7].mxu0  ;;  %v795_v30 = vpop.f32.mrb[7].mxu1 }
 0x182   : > { %827 = vst [vmem:[#allocation2 + $0x48] sm:$0xff] %v719_v19  ;;  %829 = vst [vmem:[#allocation2 + $0x58] sm:$0xff] %v792_v20  ;;  %v723_v31 = vadd.f32 %v722_v29, %v3635_v25  ;;  %v796_v32 = vadd.f32 %v795_v30, %v3637_v26 }
 0x183   : > { %830 = vst [vmem:[#allocation2 + $0x60] sm:$0xff] %v721_v27  ;;  %832 = vst [vmem:[#allocation2 + $0x70] sm:$0xff] %v794_v28 }
 0x184   : > { %831 = vst [vmem:[#allocation2 + $0x68] sm:$0xff] %v723_v31  ;;  %833 = vst [vmem:[#allocation2 + $0x78] sm:$0xff] %v796_v32 }
 0x186   : > { %v726_v35 = vpop.f32.mrb[8].mxu0  ;;  %v799_v44 = vpop.f32.mrb[8].mxu1 }
 0x187   : > { %v727_v52 = vadd.f32 %v726_v35, %v3631_v23  ;;  %v800_v55 = vadd.f32 %v799_v44, %v3633_v24  ;;  %v728_v56 = vpop.f32.mrb[9].mxu0  ;;  %v801_v59 = vpop.f32.mrb[9].mxu1 }
 0x188   : > { %v729_v1 = vadd.f32 %v728_v56, %v3635_v25  ;;  %v802_v4 = vadd.f32 %v801_v59, %v3637_v26  ;;  %v730_v5 = vpop.f32.mrb[10].mxu0  ;;  %v803_v10 = vpop.f32.mrb[10].mxu1 }
 0x189   : > { %834 = vst [vmem:[#allocation2 + $0x80] sm:$0xff] %v727_v52  ;;  %836 = vst [vmem:[#allocation2 + $0x90] sm:$0xff] %v800_v55  ;;  %v731_v13 = vadd.f32 %v730_v5, %v3631_v23  ;;  %v804_v14 = vadd.f32 %v803_v10, %v3633_v24  ;;  %v732_v15 = vpop.f32.mrb[11].mxu0  ;;  %v805_v16 = vpop.f32.mrb[11].mxu1 }
 0x18a   : > { %835 = vst [vmem:[#allocation2 + $0x88] sm:$0xff] %v729_v1  ;;  %837 = vst [vmem:[#allocation2 + $0x98] sm:$0xff] %v802_v4  ;;  %v733_v17 = vadd.f32 %v732_v15, %v3635_v25  ;;  %v806_v18 = vadd.f32 %v805_v16, %v3637_v26 }
 0x18b   : > { %838 = vst [vmem:[#allocation2 + $0xa0] sm:$0xff] %v731_v13  ;;  %840 = vst [vmem:[#allocation2 + $0xb0] sm:$0xff] %v804_v14 }
 0x18c   : > { %839 = vst [vmem:[#allocation2 + $0xa8] sm:$0xff] %v733_v17  ;;  %841 = vst [vmem:[#allocation2 + $0xb8] sm:$0xff] %v806_v18 }
 0x18e   : > { %v736_v19 = vpop.f32.mrb[12].mxu0  ;;  %v809_v20 = vpop.f32.mrb[12].mxu1 }
 0x18f   : > { %v737_v21 = vadd.f32 %v736_v19, %v3631_v23  ;;  %v810_v22 = vadd.f32 %v809_v20, %v3633_v24  ;;  %v738_v27 = vpop.f32.mrb[13].mxu0  ;;  %v811_v28 = vpop.f32.mrb[13].mxu1 }
 0x190   : > { %v739_v29 = vadd.f32 %v738_v27, %v3635_v25  ;;  %v812_v30 = vadd.f32 %v811_v28, %v3637_v26  ;;  %v740_v31 = vpop.f32.mrb[14].mxu0  ;;  %v813_v32 = vpop.f32.mrb[14].mxu1 }
 0x191   : > { %842 = vst [vmem:[#allocation2 + $0xc0] sm:$0xff] %v737_v21  ;;  %844 = vst [vmem:[#allocation2 + $0xd0] sm:$0xff] %v810_v22  ;;  %v741_v35 = vadd.f32 %v740_v31, %v3631_v23  ;;  %v814_v44 = vadd.f32 %v813_v32, %v3633_v24  ;;  %v742_v52 = vpop.f32.mrb[15].mxu0  ;;  %v815_v55 = vpop.f32.mrb[15].mxu1 }
 0x192   : > { %843 = vst [vmem:[#allocation2 + $0xc8] sm:$0xff] %v739_v29  ;;  %845 = vst [vmem:[#allocation2 + $0xd8] sm:$0xff] %v812_v30  ;;  %v743_v56 = vadd.f32 %v742_v52, %v3635_v25  ;;  %v816_v59 = vadd.f32 %v815_v55, %v3637_v26 }
 0x193   : > { %846 = vst [vmem:[#allocation2 + $0xe0] sm:$0xff] %v741_v35  ;;  %848 = vst [vmem:[#allocation2 + $0xf0] sm:$0xff] %v814_v44 }
 0x194   : > { %847 = vst [vmem:[#allocation2 + $0xe8] sm:$0xff] %v743_v56  ;;  %849 = vst [vmem:[#allocation2 + $0xf8] sm:$0xff] %v816_v59 }
 0x196   : > { %v1093_v1 = vpop.f32.mrb[16].mxu0  ;;  %v1134_v4 = vpop.f32.mrb[16].mxu1 }
 0x197   : > { %v1095_v5 = vpop.f32.mrb[17].mxu0  ;;  %v1136_v10 = vpop.f32.mrb[17].mxu1 }
 0x198   : > { %v1097_v23 = vpop.f32.mrb[18].mxu0  ;;  %v1138_v13 = vpop.f32.mrb[18].mxu1 }
 0x199   : > { %v1098_v24 = vpop.f32.mrb[19].mxu0  ;;  %v1139_v14 = vpop.f32.mrb[19].mxu1 }
 0x19b   : > { %v894_v15 = vld [vmem:[%s893_s17] sm:$0xff]  ;;  %v895_v16 = vld [vmem:[%s893_s17 + $0x8] sm:$0xff]  ;;  %v897_v19 = vld [vmem:[%s893_s17 + $0x18] sm:$0xff] }
 0x19c   : > { %v1141_v17 = vadd.f32 %v1093_v1, %v894_v15  ;;  %v1142_v25 = vadd.f32 %v1095_v5, %v895_v16  ;;  %v1144_v20 = vadd.f32 %v1136_v10, %v897_v19  ;;  %v896_v21 = vld [vmem:[%s893_s17 + $0x10] sm:$0xff]  ;;  %v1574_v15 = vstv %s1454_s18  ;;  %s2499_s17 = smul.u32 96, %s3123_s24  ;;  %s2280_s18 = scalar_lea.vmem [#allocation2], %s2509_s8 }
 0x19d   : > { %v1143_v27 = vadd.f32 %v1134_v4, %v896_v21  ;;  %v3676_v4 = vpop.permute.xlu0 %1174  ;;  %v1440_v16 = vstv %s1320_s28  ;;  %vm1575_vm7 = vcmp.lt.s32.totalorder %v1574_v15, %v3511_v54  ;;  %v2490_v21 = vld [vmem:[%s2265_s7 + $0x20] sm:$0xff]  ;;  %s2283_s28 = scalar_lea.vmem %s3683_s29, %s2517_s14 [#allocation11]  ;;  %s2158_s14 = sshll.u32 %s3683_s29, 4  ;;  %s4077_s14 = int_to_ptr.vmem [resolvable:$true] %s2158_s14 }
 0x19e   : > { %v2485_v18 = vmul.f32 -1.442695, %v1141_v17  ;;  %v2486_v26 = vmul.f32 -1.442695, %v1142_v25  ;;  %v2487_v22 = vmul.f32 -1.442695, %v1144_v20  ;;  %vm1441_vm6 = vcmp.lt.s32.totalorder %v1440_v16, %v3511_v54 }
 0x19f   : > { %vm1176_vm4 = vcmp.eq.s32.totalorder %v3676_v4, 1  ;;  %v1442_v17 = vsel %vm1441_vm6, 1, %v3140_v0  ;;  %v1843_v25 = vstv %s1723_s19  ;;  %s2273_s11 = scalar_lea.vmem [#allocation2], %s2499_s17  ;;  %s1591_s19 = scalar_lea.vmem [#allocation2], %s2565_s23 }
 0x1a0   : > { %2765 = vpow2.f32 %v2485_v18  ;;  %vm2566_vm5 = vmpackc.low %vm1176_vm4, %vm1176_vm4  ;;  %1444 = vperm.xlu1 %2664, %v1442_v17   ;;  %v1576_v18 = vsel %vm1575_vm7, 1, %v3140_v0  ;;  %vm1844_vm8 = vcmp.lt.s32.totalorder %v1843_v25, %v3511_v54  ;;  %s2558_s23 = sshll.u32 %s3123_s24, 7 }
 0x1a1   : > { %2767 = vpow2.f32 %v2486_v26  ;;  %v2113_v26 = vstv %s1993_s15  ;;  %v1845_v19 = vsel %vm1844_vm8, 1, %v3140_v0 }
 0x1a2   : > { %2769 = vpow2.f32 %v2487_v22  ;;  %vm2114_vm9 = vcmp.lt.s32.totalorder %v2113_v26, %v3511_v54 }
 0x1a3   : > { %2771 = vtanh.f32 %v1143_v27  ;;  %v2115_v20 = vsel %vm2114_vm9, 1, %v3140_v0 }
 0x1a4   : > { %1578 = vperm.xlu1 %2664, %v1576_v18  }
 0x1a8   : > { %1847 = vperm.xlu1 %2664, %v1845_v19  }
 0x1aa   : > { %v2766_v28 = vpop.eup %2765 }
 0x1ab   : > { %v2768_v29 = vpop.eup %2767  ;;  %v1148_v30 = vadd.f32 1.0, %v2766_v28 }
 0x1ac   : > { %v1154_v31 = vadd.f32 1.0, %v2768_v29  ;;  %v2770_v32 = vpop.eup %2769  ;;  %2117 = vperm.xlu1 %2664, %v2115_v20   ;;  %v2491_v29 = vld [vmem:[%s2265_s7 + $0x28] sm:$0xff] }
 0x1ad   : > { %2773 = vrcp.f32 %v1148_v30  ;;  %v2772_v35 = vpop.eup %2771  ;;  %v1161_v55 = vadd.f32 1.0, %v2770_v32 }
 0x1ae   : > { %2775 = vrcp.f32 %v1154_v31 }
 0x1af   : > { %2777 = vrcp.f32 %v1161_v55 }
 0x1b7   : > { %v2774_v44 = vpop.eup %2773 }
 0x1b8   : > { %v2776_v52 = vpop.eup %2775  ;;  %v1165_v56 = vmul.f32 %v2774_v44, %v2772_v35 }
 0x1b9   : > { %v1164_v59 = vmul.f32 0.0, %v2776_v52  ;;  %v2778_v5 = vpop.eup %2777 }
 0x1bb   : > { %v3672_v1 = vadd.f32 %v1165_v56, %v1164_v59  ;;  %v2493_v59 = vld [vmem:[%s2265_s7 + $0x38] sm:$0xff] }
 0x1bd   : > { %2779 = vtanh.f32 %v3672_v1  ;;  %v1183_v20 = vsel %vm1176_vm4, %v3672_v1, 0.0 }
 0x1c7   : > { %v2780_v10 = vpop.eup %2779 }
 0x1c8   : > { %v1168_v23 = vmul.f32 %v2780_v10, %v2778_v5  ;;  %v2492_v10 = vld [vmem:[%s2265_s7 + $0x30] sm:$0xff]  ;;  %s2533_s7 = smul.u32 4294967284, %s3123_s24 }
 0x1ca   : > { %v3688_v13 = vsel %vm1176_vm4, %v1168_v23, 0.0  ;;  %v2567_v24 = vpack.c.bf16 %v1168_v23, %v1168_v23  ;;  %s2295_s20 = scalar_lea.vmem %s3683_s29, %s2533_s7 [#allocation11] }
 0x1cb   : > { %v1178_v14 = vpack.c.bf16 %v3688_v13, %v3688_v13 }
 0x1cc   : > { %2568 = vmatmul.mubr.msk.bf16.vlgmr.msra.gmra.mrb[20].mxu0 %vm2566_vm5, %v2567_v24  ;;  %2571 = vmatmul.mubr.msk.bf16.vlgmr.msra.gmra.mrb[20].mxu1 %vm2566_vm5, %v2567_v24 }
 0x1cd   : > { %1181 = vst [vmem:[%s1180_s9] sm:$0xf] %v1178_v14  ;;  %1330 = vmatpush1.bf16.msra.mxu0 %v3441_v36  ;;  %1371 = vmatpush1.bf16.msra.mxu1 %v3444_v37  ;;  %s2277_s9 = scalar_lea.vmem %s3683_s29, %s2507_s1 [#allocation11] }
 0x1ce   : > { %1331 = vmatprep.subr.bf16.mxu0 %v3449_v38  ;;  %1372 = vmatprep.subr.bf16.mxu1 %v3452_v39 }
 0x1cf   : > { %1361 = vmatprep.mubr.bf16.mxu0 %v3140_v0  ;;  %1402 = vmatprep.mubr.bf16.mxu1 %v3140_v0 }
 0x1d1   : > { %1332 = vmatpush1.bf16.msra.mxu0 %v3455_v40  ;;  %1373 = vmatpush1.bf16.msra.mxu1 %v3463_v42 }
 0x1d2   : > { %1333 = vmatprep.subr.bf16.mxu0 %v3458_v41  ;;  %1374 = vmatprep.subr.bf16.mxu1 %v3468_v43 }
 0x1d5   : > { %1334 = vmatpush1.bf16.msra.mxu0 %v3474_v45  ;;  %1375 = vmatpush1.bf16.msra.mxu1 %v3479_v46 }
 0x1d6   : > { %1335 = vmatprep.subr.bf16.mxu0 %v3485_v47  ;;  %1376 = vmatprep.subr.bf16.mxu1 %v3488_v48 }
 0x1d9   : > { %1336 = vmatpush1.bf16.msra.mxu0 %v3491_v49  ;;  %1377 = vmatpush1.bf16.msra.mxu1 %v3499_v51 }
 0x1da   : > { %1337 = vmatprep.subr.bf16.mxu0 %v3496_v50  ;;  %1378 = vmatprep.subr.bf16.mxu1 %v3504_v53 }
 0x1dd   : > { %1338 = vmatpush1.bf16.msra.mxu0 %v3517_v57  ;;  %1379 = vmatpush1.bf16.msra.mxu1 %v3520_v58 }
 0x1de   : > { %1339 = vmatprep.subr.bf16.mxu0 %v3526_v60  ;;  %1380 = vmatprep.subr.bf16.mxu1 %v3530_v61 }
 0x1e1   : > { %1340 = vmatpush1.bf16.msra.mxu0 %v3538_v62  ;;  %1381 = vmatpush1.bf16.msra.mxu1 %v3541_v63 }
 0x1e2   : > { %1341 = vmatprep.subr.bf16.mxu0 %v3548_v2  ;;  %1382 = vmatprep.subr.bf16.mxu1 %v3551_v3 }
 0x1e5   : > { %1342 = vmatpush1.bf16.msra.mxu0 %v3559_v6  ;;  %1383 = vmatpush1.bf16.msra.mxu1 %v3562_v7 }
 0x1e6   : > { %1343 = vmatprep.subr.bf16.mxu0 %v3567_v8  ;;  %1384 = vmatprep.subr.bf16.mxu1 %v3571_v9 }
 0x1e9   : > { %1344 = vmatpush1.bf16.msra.mxu0 %v3576_v11  ;;  %1385 = vmatpush1.bf16.msra.mxu1 %v3579_v12 }
 0x1ea   : > { %1463 = vmatprep.subr.bf16.mxu0 %v3435_v33  ;;  %1504 = vmatprep.subr.bf16.mxu1 %v3438_v34 }
 0x29f   : > { %v1228_v22 = vpop.f32.mrb[20].mxu0  ;;  %v1269_v27 = vpop.f32.mrb[20].mxu1 }
 0x2a0   : > { %v1276_v28 = vadd.f32 %v2490_v21, %v1228_v22  ;;  %v1230_v30 = vpop.f32.mrb[21].mxu0  ;;  %v1271_v31 = vpop.f32.mrb[21].mxu1  ;;  %v1278_v24 = vadd.f32 %v2492_v10, %v1269_v27 }
 0x2a1   : > { %v1277_v32 = vadd.f32 %v2491_v29, %v1230_v30  ;;  %v1232_v35 = vpop.f32.mrb[22].mxu0  ;;  %v1273_v44 = vpop.f32.mrb[22].mxu1  ;;  %v1279_v5 = vadd.f32 %v2493_v59, %v1271_v31  ;;  %v2502_v59 = vld [vmem:[%s2273_s11 + $0x50] sm:$0xff] }
 0x2a2   : > { %v2494_v52 = vmul.f32 -1.442695, %v1276_v28  ;;  %v1233_v55 = vpop.f32.mrb[23].mxu0  ;;  %v1274_v56 = vpop.f32.mrb[23].mxu1 }
 0x2a3   : > { %v2495_v54 = vmul.f32 -1.442695, %v1277_v32  ;;  %v2496_v23 = vmul.f32 -1.442695, %v1279_v5  ;;  %v1310_v28 = vpop.permute.xlu0 %1309 }
 0x2a4   : > { %2781 = vpow2.f32 %v2494_v52  ;;  %vm1311_vm10 = vcmp.eq.s32.totalorder %v1310_v28, 1 }
 0x2a5   : > { %2783 = vpow2.f32 %v2495_v54 }
 0x2a6   : > { %2785 = vpow2.f32 %v2496_v23 }
 0x2a7   : > { %2787 = vtanh.f32 %v1278_v24 }
 0x2ae   : > { %v2782_v14 = vpop.eup %2781 }
 0x2af   : > { %v2784_v15 = vpop.eup %2783  ;;  %v1283_v16 = vadd.f32 1.0, %v2782_v14 }
 0x2b0   : > { %v1289_v17 = vadd.f32 1.0, %v2784_v15  ;;  %v2786_v25 = vpop.eup %2785 }
 0x2b1   : > { %2789 = vrcp.f32 %v1283_v16  ;;  %v2788_v18 = vpop.eup %2787  ;;  %v1296_v22 = vadd.f32 1.0, %v2786_v25 }
 0x2b2   : > { %2791 = vrcp.f32 %v1289_v17 }
 0x2b3   : > { %2793 = vrcp.f32 %v1296_v22 }
 0x2bb   : > { %v2790_v26 = vpop.eup %2789 }
 0x2bc   : > { %v2792_v19 = vpop.eup %2791  ;;  %v1300_v21 = vmul.f32 %v2790_v26, %v2788_v18  ;;  %v1445_v18 = vpop.permute.xlu1 %1444 }
 0x2bd   : > { %v1299_v27 = vmul.f32 %v2792_v19, %v1183_v20  ;;  %v2794_v31 = vpop.eup %2793  ;;  %vm1446_vm11 = vcmp.eq.s32.totalorder %v1445_v18, 1 }
 0x2bf   : > { %v1301_v29 = vadd.f32 %v1300_v21, %v1299_v27 }
 0x2c1   : > { %2795 = vtanh.f32 %v1301_v29  ;;  %v3742_v30 = vsel %vm1311_vm10, %v1301_v29, %v1183_v20 }
 0x2cb   : > { %v2796_v32 = vpop.eup %2795 }
 0x2cc   : > { %v1303_v35 = vmul.f32 %v2796_v32, %v2794_v31 }
 0x2ce   : > { %v1312_v44 = vsel %vm1311_vm10, %v1303_v35, 0.0  ;;  %v3747_v4 = vsel %vm1311_vm10, %v1303_v35, %v3688_v13 }
 0x2cf   : > { %v1313_v1 = vpack.c.bf16 %v1312_v44, %v1312_v44  ;;  %v1328_v52 = vpack.c.bf16 %v3747_v4, %v3747_v4 }
 0x2d1   : > { %2498 = vst [vmem:[%s2269_s30 + $0x4] sm:$0xf] %v1313_v1  ;;  %1362 = vmatmul.mubr.bf16.vlgmr.msra.gmra.mrb[24].mxu0 %v1328_v52  ;;  %1403 = vmatmul.mubr.bf16.vlgmr.msra.gmra.mrb[24].mxu1 %v1328_v52  ;;  %v3802_v52 = vld [vmem:[%s3426_s27 + $0x8] ss:$16 sps:$4 sm:$0xff]   ;;  %s2535_s30 = smul.u32 4294967136, %s3123_s24 }
 0x2d2   : > { %1464 = vmatpush1.bf16.msra.mxu0 %v3441_v36  ;;  %1505 = vmatpush1.bf16.msra.mxu1 %v3444_v37  ;;  %v2500_v36 = vld [vmem:[%s2273_s11 + $0x40] sm:$0xff] }
 0x2d3   : > { %1465 = vmatprep.subr.bf16.mxu0 %v3449_v38  ;;  %1506 = vmatprep.subr.bf16.mxu1 %v3452_v39  ;;  %s2299_s17 = scalar_lea.vmem [#allocation2], %s2535_s30 }
 0x2d4   : > { %1495 = vmatprep.mubr.bf16.mxu0 %v3140_v0  ;;  %1536 = vmatprep.mubr.bf16.mxu1 %v3140_v0 }
 0x2d6   : > { %1466 = vmatpush1.bf16.msra.mxu0 %v3455_v40  ;;  %1507 = vmatpush1.bf16.msra.mxu1 %v3463_v42  ;;  %v2501_v40 = vld [vmem:[%s2273_s11 + $0x48] sm:$0xff] }
 0x2d7   : > { %1467 = vmatprep.subr.bf16.mxu0 %v3458_v41  ;;  %1508 = vmatprep.subr.bf16.mxu1 %v3468_v43 }
 0x2da   : > { %1468 = vmatpush1.bf16.msra.mxu0 %v3474_v45  ;;  %1509 = vmatpush1.bf16.msra.mxu1 %v3479_v46 }
 0x2db   : > { %1469 = vmatprep.subr.bf16.mxu0 %v3485_v47  ;;  %1510 = vmatprep.subr.bf16.mxu1 %v3488_v48 }
 0x2de   : > { %1470 = vmatpush1.bf16.msra.mxu0 %v3491_v49  ;;  %1511 = vmatpush1.bf16.msra.mxu1 %v3499_v51 }
 0x2df   : > { %1471 = vmatprep.subr.bf16.mxu0 %v3496_v50  ;;  %1512 = vmatprep.subr.bf16.mxu1 %v3504_v53 }
 0x2e2   : > { %1472 = vmatpush1.bf16.msra.mxu0 %v3517_v57  ;;  %1513 = vmatpush1.bf16.msra.mxu1 %v3520_v58 }
 0x2e3   : > { %1473 = vmatprep.subr.bf16.mxu0 %v3526_v60  ;;  %1514 = vmatprep.subr.bf16.mxu1 %v3530_v61 }
 0x2e6   : > { %1474 = vmatpush1.bf16.msra.mxu0 %v3538_v62  ;;  %1515 = vmatpush1.bf16.msra.mxu1 %v3541_v63 }
 0x2e7   : > { %1475 = vmatprep.subr.bf16.mxu0 %v3548_v2  ;;  %1516 = vmatprep.subr.bf16.mxu1 %v3551_v3 }
 0x2ea   : > { %1476 = vmatpush1.bf16.msra.mxu0 %v3559_v6  ;;  %1517 = vmatpush1.bf16.msra.mxu1 %v3562_v7 }
 0x2eb   : > { %1477 = vmatprep.subr.bf16.mxu0 %v3567_v8  ;;  %1518 = vmatprep.subr.bf16.mxu1 %v3571_v9 }
 0x2ee   : > { %1478 = vmatpush1.bf16.msra.mxu0 %v3576_v11  ;;  %1519 = vmatpush1.bf16.msra.mxu1 %v3579_v12 }
 0x2ef   : > { %1597 = vmatprep.subr.bf16.mxu0 %v3435_v33  ;;  %1638 = vmatprep.subr.bf16.mxu1 %v3438_v34  ;;  %v2503_v33 = vld [vmem:[%s2273_s11 + $0x58] sm:$0xff]  ;;  %s2543_s11 = smul.u32 4294967276, %s3123_s24 }
 0x2f1   : > { %s2303_s1 = scalar_lea.vmem %s3683_s29, %s2543_s11 [#allocation11] }
 0x3a4   : > { %v1363_v37 = vpop.f32.mrb[24].mxu0  ;;  %v1404_v38 = vpop.f32.mrb[24].mxu1 }
 0x3a5   : > { %v1411_v39 = vadd.f32 %v2500_v36, %v1363_v37  ;;  %v1365_v41 = vpop.f32.mrb[25].mxu0  ;;  %v1406_v42 = vpop.f32.mrb[25].mxu1  ;;  %v1413_v10 = vadd.f32 %v2502_v59, %v1404_v38  ;;  %v3810_v36 = vld [vmem:[%s3426_s27 + $0x2c] ss:$16 sps:$4 sm:$0xff]   ;;  %v3816_v37 = vld [vmem:[%s3426_s27 + $0x20] ss:$16 sps:$4 sm:$0xff]  }
 0x3a6   : > { %v1412_v43 = vadd.f32 %v2501_v40, %v1365_v41  ;;  %v1367_v45 = vpop.f32.mrb[26].mxu0  ;;  %v1408_v46 = vpop.f32.mrb[26].mxu1  ;;  %v1414_v34 = vadd.f32 %v2503_v33, %v1406_v42  ;;  %v3820_v38 = vld [vmem:[%s3426_s27 + $0x28] ss:$16 sps:$4 sm:$0xff]   ;;  %v3828_v40 = vld [vmem:[%s3426_s27 + $0x4c] ss:$16 sps:$4 sm:$0xff]  }
 0x3a7   : > { %v2504_v13 = vmul.f32 -1.442695, %v1411_v39  ;;  %v1368_v55 = vpop.f32.mrb[27].mxu0  ;;  %v1409_v56 = vpop.f32.mrb[27].mxu1  ;;  %v3824_v39 = vld [vmem:[%s3426_s27 + $0x44] ss:$16 sps:$4 sm:$0xff]  }
 0x3a8   : > { %v2505_v54 = vmul.f32 -1.442695, %v1412_v43  ;;  %v2506_v5 = vmul.f32 -1.442695, %v1414_v34  ;;  %v3832_v41 = vld [vmem:[%s3426_s27 + $0x40] ss:$16 sps:$4 sm:$0xff]  }
 0x3a9   : > { %2797 = vpow2.f32 %v2504_v13  ;;  %v3836_v42 = vld [vmem:[%s3426_s27 + $0x48] ss:$16 sps:$4 sm:$0xff]  }
 0x3aa   : > { %2799 = vpow2.f32 %v2505_v54 }
 0x3ab   : > { %2801 = vpow2.f32 %v2506_v5 }
 0x3ac   : > { %2803 = vtanh.f32 %v1413_v10 }
 0x3b3   : > { %v2798_v23 = vpop.eup %2797 }
 0x3b4   : > { %v2800_v24 = vpop.eup %2799  ;;  %v1418_v14 = vadd.f32 1.0, %v2798_v23  ;;  %v1579_v23 = vpop.permute.xlu1 %1578 }
 0x3b5   : > { %v1424_v15 = vadd.f32 1.0, %v2800_v24  ;;  %v2802_v16 = vpop.eup %2801  ;;  %vm1580_vm12 = vcmp.eq.s32.totalorder %v1579_v23, 1 }
 0x3b6   : > { %2805 = vrcp.f32 %v1418_v14  ;;  %v2804_v17 = vpop.eup %2803  ;;  %v1431_v19 = vadd.f32 1.0, %v2802_v16 }
 0x3b7   : > { %2807 = vrcp.f32 %v1424_v15 }
 0x3b8   : > { %2809 = vrcp.f32 %v1431_v19 }
 0x3c0   : > { %v2806_v25 = vpop.eup %2805 }
 0x3c1   : > { %v2808_v26 = vpop.eup %2807  ;;  %v1435_v20 = vmul.f32 %v2806_v25, %v2804_v17 }
 0x3c2   : > { %v1434_v21 = vmul.f32 %v2808_v26, %v3742_v30  ;;  %v2810_v28 = vpop.eup %2809 }
 0x3c4   : > { %v1436_v22 = vadd.f32 %v1435_v20, %v1434_v21  ;;  %v3892_v20 = vld [vmem:[%s3426_s27 + $0x64] ss:$16 sps:$4 sm:$0xff]   ;;  %v3896_v21 = vld [vmem:[%s3426_s27 + $0x6c] ss:$16 sps:$4 sm:$0xff]  }
 0x3c6   : > { %2811 = vtanh.f32 %v1436_v22  ;;  %v3788_v27 = vsel %vm1446_vm11, %v1436_v22, %v3742_v30  ;;  %v3798_v30 = vld [vmem:[%s3426_s27] ss:$16 sps:$4 sm:$0xff]  }
 0x3c7   : > { %v3900_v22 = vld [vmem:[%s3426_s27 + $0x60] ss:$16 sps:$4 sm:$0xff]  }
 0x3d0   : > { %v2812_v29 = vpop.eup %2811 }
 0x3d1   : > { %v1438_v31 = vmul.f32 %v2812_v29, %v2810_v28  ;;  %v3908_v28 = vld [vmem:[%s3426_s27 + $0x84] ss:$16 sps:$4 sm:$0xff]   ;;  %v3912_v29 = vld [vmem:[%s3426_s27 + $0x8c] ss:$16 sps:$4 sm:$0xff]  }
 0x3d3   : > { %v1447_v32 = vsel %vm1446_vm11, %v1438_v31, 0.0  ;;  %v3793_v35 = vsel %vm1446_vm11, %v1438_v31, %v3747_v4  ;;  %v3806_v4 = vld [vmem:[%s3426_s27 + $0x24] ss:$16 sps:$4 sm:$0xff]   ;;  %v3916_v31 = vld [vmem:[%s3426_s27 + $0x80] ss:$16 sps:$4 sm:$0xff]  }
 0x3d4   : > { %v1448_v44 = vpack.c.bf16 %v1447_v32, %v1447_v32  ;;  %v1462_v1 = vpack.c.bf16 %v3793_v35, %v3793_v35  ;;  %v3920_v32 = vld [vmem:[%s3426_s27 + $0x88] ss:$16 sps:$4 sm:$0xff]  }
 0x3d6   : > { %2508 = vst [vmem:[%s2277_s9 + $0x8] sm:$0xf] %v1448_v44  ;;  %1496 = vmatmul.mubr.bf16.vlgmr.msra.gmra.mrb[28].mxu0 %v1462_v1  ;;  %1537 = vmatmul.mubr.bf16.vlgmr.msra.gmra.mrb[28].mxu1 %v1462_v1  ;;  %v3928_v44 = vld [vmem:[%s3426_s27 + $0xac] ss:$16 sps:$4 sm:$0xff]   ;;  %v3932_v1 = vld [vmem:[%s3426_s27 + $0xa0] ss:$16 sps:$4 sm:$0xff]  }
 0x3d7   : > { %1598 = vmatpush1.bf16.msra.mxu0 %v3798_v30  ;;  %1639 = vmatpush1.bf16.msra.mxu1 %v3802_v52  ;;  %s2545_s9 = smul.u32 4294967072, %s3123_s24 }
 0x3d8   : > { %1599 = vmatprep.subr.bf16.mxu0 %v3806_v4  ;;  %1640 = vmatprep.subr.bf16.mxu1 %v3810_v36 }
 0x3d9   : > { %1629 = vmatprep.mubr.bf16.mxu0 %v3140_v0  ;;  %1670 = vmatprep.mubr.bf16.mxu1 %v3140_v0  ;;  %s2307_s8 = scalar_lea.vmem [#allocation2], %s2545_s9 }
 0x3db   : > { %1600 = vmatpush1.bf16.msra.mxu0 %v3816_v37  ;;  %1641 = vmatpush1.bf16.msra.mxu1 %v3820_v38 }
 0x3dc   : > { %1601 = vmatprep.subr.bf16.mxu0 %v3824_v39  ;;  %1642 = vmatprep.subr.bf16.mxu1 %v3828_v40 }
 0x3df   : > { %1602 = vmatpush1.bf16.msra.mxu0 %v3832_v41  ;;  %1643 = vmatpush1.bf16.msra.mxu1 %v3836_v42 }
 0x3e0   : > { %1603 = vmatprep.subr.bf16.mxu0 %v3485_v47  ;;  %1644 = vmatprep.subr.bf16.mxu1 %v3488_v48  ;;  %v3860_v47 = vld [vmem:[%s3426_s27 + $0x4] ss:$16 sps:$4 sm:$0xff]   ;;  %v3864_v48 = vld [vmem:[%s3426_s27 + $0xc] ss:$16 sps:$4 sm:$0xff]  }
 0x3e3   : > { %1604 = vmatpush1.bf16.msra.mxu0 %v3491_v49  ;;  %1645 = vmatpush1.bf16.msra.mxu1 %v3499_v51  ;;  %v2510_v49 = vld [vmem:[%s2280_s18 + $0x60] sm:$0xff] }
 0x3e4   : > { %1605 = vmatprep.subr.bf16.mxu0 %v3496_v50  ;;  %1646 = vmatprep.subr.bf16.mxu1 %v3504_v53 }
 0x3e7   : > { %1606 = vmatpush1.bf16.msra.mxu0 %v3517_v57  ;;  %1647 = vmatpush1.bf16.msra.mxu1 %v3520_v58  ;;  %v2511_v57 = vld [vmem:[%s2280_s18 + $0x68] sm:$0xff] }
 0x3e8   : > { %1607 = vmatprep.subr.bf16.mxu0 %v3526_v60  ;;  %1648 = vmatprep.subr.bf16.mxu1 %v3530_v61 }
 0x3eb   : > { %1608 = vmatpush1.bf16.msra.mxu0 %v3538_v62  ;;  %1649 = vmatpush1.bf16.msra.mxu1 %v3541_v63 }
 0x3ec   : > { %1609 = vmatprep.subr.bf16.mxu0 %v3548_v2  ;;  %1650 = vmatprep.subr.bf16.mxu1 %v3551_v3 }
 0x3ef   : > { %1610 = vmatpush1.bf16.msra.mxu0 %v3559_v6  ;;  %1651 = vmatpush1.bf16.msra.mxu1 %v3562_v7 }
 0x3f0   : > { %1611 = vmatprep.subr.bf16.mxu0 %v3567_v8  ;;  %1652 = vmatprep.subr.bf16.mxu1 %v3571_v9  ;;  %v2513_v8 = vld [vmem:[%s2280_s18 + $0x78] sm:$0xff] }
 0x3f3   : > { %1612 = vmatpush1.bf16.msra.mxu0 %v3576_v11  ;;  %1653 = vmatpush1.bf16.msra.mxu1 %v3579_v12  ;;  %v2512_v11 = vld [vmem:[%s2280_s18 + $0x70] sm:$0xff]  ;;  %s2413_s18 = sshll.u32 %s3383_s13, 3 }
 0x3f4   : > { %1732 = vmatprep.subr.bf16.mxu0 %v3860_v47  ;;  %1773 = vmatprep.subr.bf16.mxu1 %v3864_v48 }
 0x4a9   : > { %v1497_v50 = vpop.f32.mrb[28].mxu0  ;;  %v1538_v51 = vpop.f32.mrb[28].mxu1 }
 0x4aa   : > { %v1545_v53 = vadd.f32 %v2510_v49, %v1497_v50  ;;  %v1499_v58 = vpop.f32.mrb[29].mxu0  ;;  %v1540_v60 = vpop.f32.mrb[29].mxu1  ;;  %v1547_v43 = vadd.f32 %v2512_v11, %v1538_v51  ;;  %v3936_v49 = vld [vmem:[%s3426_s27 + $0xa8] ss:$16 sps:$4 sm:$0xff]   ;;  %v3940_v50 = vld [vmem:[%s3426_s27 + $0xc4] ss:$16 sps:$4 sm:$0xff]  }
 0x4ab   : > { %v1546_v61 = vadd.f32 %v2511_v57, %v1499_v58  ;;  %v1501_v62 = vpop.f32.mrb[30].mxu0  ;;  %v1542_v63 = vpop.f32.mrb[30].mxu1  ;;  %v1548_v9 = vadd.f32 %v2513_v8, %v1540_v60  ;;  %v3944_v51 = vld [vmem:[%s3426_s27 + $0xcc] ss:$16 sps:$4 sm:$0xff]   ;;  %v3952_v57 = vld [vmem:[%s3426_s27 + $0xc8] ss:$16 sps:$4 sm:$0xff]  }
 0x4ac   : > { %v2514_v2 = vmul.f32 -1.442695, %v1545_v53  ;;  %v1502_v3 = vpop.f32.mrb[31].mxu0  ;;  %v1543_v6 = vpop.f32.mrb[31].mxu1  ;;  %v3948_v53 = vld [vmem:[%s3426_s27 + $0xc0] ss:$16 sps:$4 sm:$0xff]  }
 0x4ad   : > { %v2515_v7 = vmul.f32 -1.442695, %v1546_v61  ;;  %v2516_v12 = vmul.f32 -1.442695, %v1548_v9  ;;  %v3956_v58 = vld [vmem:[%s3426_s27 + $0xe4] ss:$16 sps:$4 sm:$0xff]  }
 0x4ae   : > { %2813 = vpow2.f32 %v2514_v2  ;;  %v3960_v60 = vld [vmem:[%s3426_s27 + $0xec] ss:$16 sps:$4 sm:$0xff]   ;;  %v3964_v61 = vld [vmem:[%s3426_s27 + $0xe0] ss:$16 sps:$4 sm:$0xff]   ;;  %v3968_v62 = vld [vmem:[%s3426_s27 + $0xe8] ss:$16 sps:$4 sm:$0xff]  }
 0x4af   : > { %2815 = vpow2.f32 %v2515_v7  ;;  %v1592_v63 = vld [vmem:[%s1591_s19] sm:$0xff]  ;;  %v1594_v3 = vld [vmem:[%s1591_s19 + $0x10] sm:$0xff]  ;;  %v1593_v9 = vld [vmem:[%s1591_s19 + $0x8] sm:$0xff] }
 0x4b0   : > { %2817 = vpow2.f32 %v2516_v12  ;;  %v1595_v12 = vld [vmem:[%s1591_s19 + $0x18] sm:$0xff]  ;;  %s404_s19 = scalar_lea.vmem [#allocation12], %s2413_s18 }
 0x4b1   : > { %2819 = vtanh.f32 %v1547_v43 }
 0x4b8   : > { %v2814_v45 = vpop.eup %2813 }
 0x4b9   : > { %v2816_v46 = vpop.eup %2815  ;;  %v1552_v13 = vadd.f32 1.0, %v2814_v45 }
 0x4ba   : > { %v1558_v55 = vadd.f32 1.0, %v2816_v46  ;;  %v2818_v56 = vpop.eup %2817 }
 0x4bb   : > { %2821 = vrcp.f32 %v1552_v13  ;;  %v2820_v54 = vpop.eup %2819  ;;  %v1565_v5 = vadd.f32 1.0, %v2818_v56 }
 0x4bc   : > { %2823 = vrcp.f32 %v1558_v55 }
 0x4bd   : > { %2825 = vrcp.f32 %v1565_v5 }
 0x4c5   : > { %v2822_v33 = vpop.eup %2821 }
 0x4c6   : > { %v2824_v34 = vpop.eup %2823  ;;  %v1569_v59 = vmul.f32 %v2822_v33, %v2820_v54 }
 0x4c7   : > { %v1568_v10 = vmul.f32 %v2824_v34, %v3788_v27  ;;  %v2826_v15 = vpop.eup %2825 }
 0x4c9   : > { %v1570_v24 = vadd.f32 %v1569_v59, %v1568_v10 }
 0x4cb   : > { %2827 = vtanh.f32 %v1570_v24  ;;  %v3870_v14 = vsel %vm1580_vm12, %v1570_v24, %v3788_v27  ;;  %v3904_v27 = vld [vmem:[%s3426_s27 + $0x68] ss:$16 sps:$4 sm:$0xff]  }
 0x4d5   : > { %v2828_v16 = vpop.eup %2827 }
 0x4d6   : > { %v1572_v17 = vmul.f32 %v2828_v16, %v2826_v15 }
 0x4d8   : > { %v1581_v25 = vsel %vm1580_vm12, %v1572_v17, 0.0  ;;  %v3875_v18 = vsel %vm1580_vm12, %v1572_v17, %v3793_v35  ;;  %v3924_v35 = vld [vmem:[%s3426_s27 + $0xa4] ss:$16 sps:$4 sm:$0xff]   ;;  %s2524_s27 = sshll.u32 %s3533_s16, 2  ;;  %s2525_s16 = smul.u32 4294967200, %s3123_s24 }
 0x4d9   : > { %v1582_v26 = vpack.c.bf16 %v1581_v25, %v1581_v25  ;;  %v1596_v19 = vpack.c.bf16 %v3875_v18, %v3875_v18  ;;  %s1718_s15 = scalar_lea.vmem %s3683_s29, %s2524_s27 [#allocation11]  ;;  %s2174_s27 = sshll.u32 %s404_s19, 4  ;;  %s4089_s27 = int_to_ptr.vmem [resolvable:$true] %s2174_s27 }
 0x4da   : > { %s2291_s25 = scalar_lea.vmem [#allocation2], %s2525_s16  ;;  %s2557_s16 = sshll.u32 %s3123_s24, 6 }
 0x4db   : > { %2518 = vst [vmem:[%s2283_s28 + $0xc] sm:$0xf] %v1582_v26  ;;  %1630 = vmatmul.mubr.bf16.vlgmr.msra.gmra.mrb[32].mxu0 %v1596_v19  ;;  %1671 = vmatmul.mubr.bf16.vlgmr.msra.gmra.mrb[32].mxu1 %v1596_v19  ;;  %s2553_s28 = smul.u32 4294967268, %s3123_s24  ;;  %s4094_s11 = scalar_lea.hbm %s4172_s5, %s2557_s16 }
 0x4dc   : > { %1733 = vmatpush1.bf16.msra.mxu0 %v3798_v30  ;;  %1774 = vmatpush1.bf16.msra.mxu1 %v3802_v52  ;;  %s2139_s24 = scalar_lea.sflag [#allocation13], %s3383_s13 }
 0x4dd   : > { %1734 = vmatprep.subr.bf16.mxu0 %v3806_v4  ;;  %1775 = vmatprep.subr.bf16.mxu1 %v3810_v36 }
 0x4de   : > { %1764 = vmatprep.mubr.bf16.mxu0 %v3140_v0  ;;  %1805 = vmatprep.mubr.bf16.mxu1 %v3140_v0 }
 0x4e0   : > { %1735 = vmatpush1.bf16.msra.mxu0 %v3816_v37  ;;  %1776 = vmatpush1.bf16.msra.mxu1 %v3820_v38 }
 0x4e1   : > { %1736 = vmatprep.subr.bf16.mxu0 %v3824_v39  ;;  %1777 = vmatprep.subr.bf16.mxu1 %v3828_v40 }
 0x4e4   : > { %1737 = vmatpush1.bf16.msra.mxu0 %v3832_v41  ;;  %1778 = vmatpush1.bf16.msra.mxu1 %v3836_v42 }
 0x4e5   : > { %1738 = vmatprep.subr.bf16.mxu0 %v3892_v20  ;;  %1779 = vmatprep.subr.bf16.mxu1 %v3896_v21 }
 0x4e8   : > { %1739 = vmatpush1.bf16.msra.mxu0 %v3900_v22  ;;  %1780 = vmatpush1.bf16.msra.mxu1 %v3904_v27 }
 0x4e9   : > { %1740 = vmatprep.subr.bf16.mxu0 %v3908_v28  ;;  %1781 = vmatprep.subr.bf16.mxu1 %v3912_v29 }
 0x4ec   : > { %1741 = vmatpush1.bf16.msra.mxu0 %v3916_v31  ;;  %1782 = vmatpush1.bf16.msra.mxu1 %v3920_v32 }
 0x4ed   : > { %1742 = vmatprep.subr.bf16.mxu0 %v3924_v35  ;;  %1783 = vmatprep.subr.bf16.mxu1 %v3928_v44 }
 0x4f0   : > { %1743 = vmatpush1.bf16.msra.mxu0 %v3932_v1  ;;  %1784 = vmatpush1.bf16.msra.mxu1 %v3936_v49 }
 0x4f1   : > { %1744 = vmatprep.subr.bf16.mxu0 %v3940_v50  ;;  %1785 = vmatprep.subr.bf16.mxu1 %v3944_v51 }
 0x4f4   : > { %1745 = vmatpush1.bf16.msra.mxu0 %v3948_v53  ;;  %1786 = vmatpush1.bf16.msra.mxu1 %v3952_v57 }
 0x4f5   : > { %1746 = vmatprep.subr.bf16.mxu0 %v3956_v58  ;;  %1787 = vmatprep.subr.bf16.mxu1 %v3960_v60 }
 0x4f8   : > { %1747 = vmatpush1.bf16.msra.mxu0 %v3964_v61  ;;  %1788 = vmatpush1.bf16.msra.mxu1 %v3968_v62 }
 0x4f9   : > { %1867 = vmatprep.subr.bf16.mxu0 %v3860_v47  ;;  %1908 = vmatprep.subr.bf16.mxu1 %v3864_v48 }
 0x5ae   : > { %v1631_v2 = vpop.f32.mrb[32].mxu0  ;;  %v1672_v6 = vpop.f32.mrb[32].mxu1 }
 0x5af   : > { %v1679_v7 = vadd.f32 %v1631_v2, %v1592_v63  ;;  %v1681_v8 = vadd.f32 %v1672_v6, %v1594_v3  ;;  %v1633_v11 = vpop.f32.mrb[33].mxu0  ;;  %v1674_v43 = vpop.f32.mrb[33].mxu1 }
 0x5b0   : > { %v1680_v45 = vadd.f32 %v1633_v11, %v1593_v9  ;;  %v1682_v46 = vadd.f32 %v1674_v43, %v1595_v12  ;;  %v1635_v13 = vpop.f32.mrb[34].mxu0  ;;  %v1676_v55 = vpop.f32.mrb[34].mxu1 }
 0x5b1   : > { %v2521_v56 = vmul.f32 -1.442695, %v1679_v7  ;;  %v1636_v54 = vpop.f32.mrb[35].mxu0  ;;  %v1677_v33 = vpop.f32.mrb[35].mxu1  ;;  %v2527_v55 = vld [vmem:[%s2291_s25 + $0xa8] sm:$0xff] }
 0x5b2   : > { %v2522_v34 = vmul.f32 -1.442695, %v1680_v45  ;;  %v2523_v59 = vmul.f32 -1.442695, %v1682_v46  ;;  %v1713_v2 = vpop.permute.xlu0 %1712 }
 0x5b3   : > { %2829 = vpow2.f32 %v2521_v56  ;;  %vm1714_vm13 = vcmp.eq.s32.totalorder %v1713_v2, 1 }
 0x5b4   : > { %2831 = vpow2.f32 %v2522_v34 }
 0x5b5   : > { %2833 = vpow2.f32 %v2523_v59 }
 0x5b6   : > { %2835 = vtanh.f32 %v1681_v8 }
 0x5bd   : > { %v2830_v5 = vpop.eup %2829 }
 0x5be   : > { %v2832_v10 = vpop.eup %2831  ;;  %v1686_v23 = vadd.f32 1.0, %v2830_v5 }
 0x5bf   : > { %v1692_v24 = vadd.f32 1.0, %v2832_v10  ;;  %v2834_v15 = vpop.eup %2833 }
 0x5c0   : > { %2837 = vrcp.f32 %v1686_v23  ;;  %v2836_v16 = vpop.eup %2835  ;;  %v1699_v19 = vadd.f32 1.0, %v2834_v15  ;;  %v2528_v15 = vld [vmem:[%s2291_s25 + $0xb0] sm:$0xff] }
 0x5c1   : > { %2839 = vrcp.f32 %v1692_v24 }
 0x5c2   : > { %2841 = vrcp.f32 %v1699_v19 }
 0x5ca   : > { %v2838_v17 = vpop.eup %2837 }
 0x5cb   : > { %v2840_v25 = vpop.eup %2839  ;;  %v1703_v26 = vmul.f32 %v2838_v17, %v2836_v16 }
 0x5cc   : > { %v1702_v63 = vmul.f32 %v2840_v25, %v3870_v14  ;;  %v2842_v7 = vpop.eup %2841 }
 0x5ce   : > { %v1704_v3 = vadd.f32 %v1703_v26, %v1702_v63 }
 0x5d0   : > { %2843 = vtanh.f32 %v1704_v3  ;;  %v3976_v6 = vsel %vm1714_vm13, %v1704_v3, %v3870_v14  ;;  %v2526_v14 = vld [vmem:[%s2291_s25 + $0xa0] sm:$0xff] }
 0x5da   : > { %v2844_v8 = vpop.eup %2843 }
 0x5db   : > { %v1706_v9 = vmul.f32 %v2844_v8, %v2842_v7 }
 0x5dd   : > { %v1715_v11 = vsel %vm1714_vm13, %v1706_v9, 0.0  ;;  %v3981_v12 = vsel %vm1714_vm13, %v1706_v9, %v3875_v18 }
 0x5de   : > { %v1716_v43 = vpack.c.bf16 %v1715_v11, %v1715_v11  ;;  %v1731_v45 = vpack.c.bf16 %v3981_v12, %v3981_v12 }
 0x5e0   : > { %1719 = vst [vmem:[%s1718_s15] sm:$0xf] %v1716_v43  ;;  %1765 = vmatmul.mubr.bf16.vlgmr.msra.gmra.mrb[36].mxu0 %v1731_v45  ;;  %1806 = vmatmul.mubr.bf16.vlgmr.msra.gmra.mrb[36].mxu1 %v1731_v45  ;;  %v1848_v45 = vpop.permute.xlu1 %1847  ;;  %s4081_s15 = scalar_lea.vmem %s3683_s29, %s2553_s28 [#allocation11]  ;;  %s3013_s29 = scalar_lea.vmem %s4089_s27, 128 }
 0x5e1   : > { %1868 = vmatpush1.bf16.msra.mxu0 %v3798_v30  ;;  %1909 = vmatpush1.bf16.msra.mxu1 %v3802_v52  ;;  %vm1849_vm14 = vcmp.eq.s32.totalorder %v1848_v45, 1  ;;  %v2549_v45 = vld [vmem:[%s2307_s8 + $0xf8] sm:$0xff]  ;;  %p3014_p9 = scmp.ne.s32.totalorder %s4089_s27, %s3013_s29 }
 0x5e2   : > { %1869 = vmatprep.subr.bf16.mxu0 %v3806_v4  ;;  %1910 = vmatprep.subr.bf16.mxu1 %v3810_v36 }
 0x5e3   : > { %1899 = vmatprep.mubr.bf16.mxu0 %v3140_v0  ;;  %1940 = vmatprep.mubr.bf16.mxu1 %v3140_v0  ;;  %p3015_p12 = pnand %p3014_p9, %p4213_p7 }
 0x5e5   : > { %1870 = vmatpush1.bf16.msra.mxu0 %v3816_v37  ;;  %1911 = vmatpush1.bf16.msra.mxu1 %v3820_v38  ;;  %p3016_p13 = pneg %p3015_p12 }
 0x5e6   : > { %1871 = vmatprep.subr.bf16.mxu0 %v3824_v39  ;;  %1912 = vmatprep.subr.bf16.mxu1 %v3828_v40 }
 0x5e9   : > { %1872 = vmatpush1.bf16.msra.mxu0 %v3832_v41  ;;  %1913 = vmatpush1.bf16.msra.mxu1 %v3836_v42 }
 0x5ea   : > { %1873 = vmatprep.subr.bf16.mxu0 %v3892_v20  ;;  %1914 = vmatprep.subr.bf16.mxu1 %v3896_v21 }
 0x5ed   : > { %1874 = vmatpush1.bf16.msra.mxu0 %v3900_v22  ;;  %1915 = vmatpush1.bf16.msra.mxu1 %v3904_v27 }
 0x5ee   : > { %1875 = vmatprep.subr.bf16.mxu0 %v3908_v28  ;;  %1916 = vmatprep.subr.bf16.mxu1 %v3912_v29 }
 0x5f1   : > { %1876 = vmatpush1.bf16.msra.mxu0 %v3916_v31  ;;  %1917 = vmatpush1.bf16.msra.mxu1 %v3920_v32 }
 0x5f2   : > { %1877 = vmatprep.subr.bf16.mxu0 %v3924_v35  ;;  %1918 = vmatprep.subr.bf16.mxu1 %v3928_v44 }
 0x5f5   : > { %1878 = vmatpush1.bf16.msra.mxu0 %v3932_v1  ;;  %1919 = vmatpush1.bf16.msra.mxu1 %v3936_v49 }
 0x5f6   : > { %1879 = vmatprep.subr.bf16.mxu0 %v3940_v50  ;;  %1920 = vmatprep.subr.bf16.mxu1 %v3944_v51 }
 0x5f9   : > { %1880 = vmatpush1.bf16.msra.mxu0 %v3948_v53  ;;  %1921 = vmatpush1.bf16.msra.mxu1 %v3952_v57 }
 0x5fa   : > { %1881 = vmatprep.subr.bf16.mxu0 %v3956_v58  ;;  %1922 = vmatprep.subr.bf16.mxu1 %v3960_v60 }
 0x5fd   : > { %1882 = vmatpush1.bf16.msra.mxu0 %v3964_v61  ;;  %1923 = vmatpush1.bf16.msra.mxu1 %v3968_v62 }
 0x5fe   : > { %2002 = vmatprep.subr.bf16.mxu0 %v3860_v47  ;;  %2043 = vmatprep.subr.bf16.mxu1 %v3864_v48  ;;  %v2529_v47 = vld [vmem:[%s2291_s25 + $0xb8] sm:$0xff] }
 0x6b3   : > { %v1766_v18 = vpop.f32.mrb[36].mxu0  ;;  %v1807_v46 = vpop.f32.mrb[36].mxu1 }
 0x6b4   : > { %v1814_v13 = vadd.f32 %v2526_v14, %v1766_v18  ;;  %v1768_v56 = vpop.f32.mrb[37].mxu0  ;;  %v1809_v54 = vpop.f32.mrb[37].mxu1  ;;  %v1816_v17 = vadd.f32 %v2528_v15, %v1807_v46  ;;  %v2546_v15 = vld [vmem:[%s2307_s8 + $0xe0] sm:$0xff] }
 0x6b5   : > { %v1815_v33 = vadd.f32 %v2527_v55, %v1768_v56  ;;  %v1770_v34 = vpop.f32.mrb[38].mxu0  ;;  %v1811_v59 = vpop.f32.mrb[38].mxu1  ;;  %v1817_v48 = vadd.f32 %v2529_v47, %v1809_v54 }
 0x6b6   : > { %v2530_v5 = vmul.f32 -1.442695, %v1814_v13  ;;  %v1771_v10 = vpop.f32.mrb[39].mxu0  ;;  %v1812_v23 = vpop.f32.mrb[39].mxu1 }
 0x6b7   : > { %v2531_v24 = vmul.f32 -1.442695, %v1815_v33  ;;  %v2532_v16 = vmul.f32 -1.442695, %v1817_v48 }
 0x6b8   : > { %2845 = vpow2.f32 %v2530_v5 }
 0x6b9   : > { %2847 = vpow2.f32 %v2531_v24 }
 0x6ba   : > { %2849 = vpow2.f32 %v2532_v16 }
 0x6bb   : > { %2851 = vtanh.f32 %v1816_v17 }
 0x6c2   : > { %v2846_v25 = vpop.eup %2845 }
 0x6c3   : > { %v2848_v26 = vpop.eup %2847  ;;  %v1821_v19 = vadd.f32 1.0, %v2846_v25 }
 0x6c4   : > { %v1827_v63 = vadd.f32 1.0, %v2848_v26  ;;  %v2850_v2 = vpop.eup %2849  ;;  %v2547_v26 = vld [vmem:[%s2307_s8 + $0xe8] sm:$0xff] }
 0x6c5   : > { %2853 = vrcp.f32 %v1821_v19  ;;  %v2852_v3 = vpop.eup %2851  ;;  %v1834_v11 = vadd.f32 1.0, %v2850_v2 }
 0x6c6   : > { %2855 = vrcp.f32 %v1827_v63 }
 0x6c7   : > { %2857 = vrcp.f32 %v1834_v11 }
 0x6cf   : > { %v2854_v7 = vpop.eup %2853 }
 0x6d0   : > { %v2856_v8 = vpop.eup %2855  ;;  %v1838_v9 = vmul.f32 %v2854_v7, %v2852_v3 }
 0x6d1   : > { %v1837_v43 = vmul.f32 %v2856_v8, %v3976_v6  ;;  %v2858_v46 = vpop.eup %2857 }
 0x6d3   : > { %v1839_v14 = vadd.f32 %v1838_v9, %v1837_v43 }
 0x6d5   : > { %2859 = vtanh.f32 %v1839_v14  ;;  %v4022_v18 = vsel %vm1849_vm14, %v1839_v14, %v3976_v6 }
 0x6df   : > { %v2860_v13 = vpop.eup %2859 }
 0x6e0   : > { %v1841_v55 = vmul.f32 %v2860_v13, %v2858_v46 }
 0x6e2   : > { %v1850_v56 = vsel %vm1849_vm14, %v1841_v55, 0.0  ;;  %v4027_v54 = vsel %vm1849_vm14, %v1841_v55, %v3981_v12 }
 0x6e3   : > { %v1851_v33 = vpack.c.bf16 %v1850_v56, %v1850_v56  ;;  %v1866_v34 = vpack.c.bf16 %v4027_v54, %v4027_v54 }
 0x6e5   : > { %2534 = vst [vmem:[%s2295_s20 + $0x14] sm:$0xf] %v1851_v33  ;;  %1900 = vmatmul.mubr.bf16.vlgmr.msra.gmra.mrb[40].mxu0 %v1866_v34  ;;  %1941 = vmatmul.mubr.bf16.vlgmr.msra.gmra.mrb[40].mxu1 %v1866_v34  ;;  %s4087_s20 = scalar_lea.hbm %s4173_s6, %s2558_s23 }
 0x6e6   : > { %2003 = vmatpush1.bf16.msra.mxu0 %v3798_v30  ;;  %2044 = vmatpush1.bf16.msra.mxu1 %v3802_v52 }
 0x6e7   : > { %2004 = vmatprep.subr.bf16.mxu0 %v3806_v4  ;;  %2045 = vmatprep.subr.bf16.mxu1 %v3810_v36  ;;  %v2537_v36 = vld [vmem:[%s2299_s17 + $0xc8] sm:$0xff] }
 0x6e8   : > { %2034 = vmatprep.mubr.bf16.mxu0 %v3140_v0  ;;  %2075 = vmatprep.mubr.bf16.mxu1 %v3140_v0  ;;  %v2536_v0 = vld [vmem:[%s2299_s17 + $0xc0] sm:$0xff] }
 0x6ea   : > { %2005 = vmatpush1.bf16.msra.mxu0 %v3816_v37  ;;  %2046 = vmatpush1.bf16.msra.mxu1 %v3820_v38 }
 0x6eb   : > { %2006 = vmatprep.subr.bf16.mxu0 %v3824_v39  ;;  %2047 = vmatprep.subr.bf16.mxu1 %v3828_v40 }
 0x6ee   : > { %2007 = vmatpush1.bf16.msra.mxu0 %v3832_v41  ;;  %2048 = vmatpush1.bf16.msra.mxu1 %v3836_v42 }
 0x6ef   : > { %2008 = vmatprep.subr.bf16.mxu0 %v3892_v20  ;;  %2049 = vmatprep.subr.bf16.mxu1 %v3896_v21 }
 0x6f2   : > { %2009 = vmatpush1.bf16.msra.mxu0 %v3900_v22  ;;  %2050 = vmatpush1.bf16.msra.mxu1 %v3904_v27  ;;  %v2539_v27 = vld [vmem:[%s2299_s17 + $0xd8] sm:$0xff] }
 0x6f3   : > { %2010 = vmatprep.subr.bf16.mxu0 %v3908_v28  ;;  %2051 = vmatprep.subr.bf16.mxu1 %v3912_v29  ;;  %v2538_v29 = vld [vmem:[%s2299_s17 + $0xd0] sm:$0xff] }
 0x6f6   : > { %2011 = vmatpush1.bf16.msra.mxu0 %v3916_v31  ;;  %2052 = vmatpush1.bf16.msra.mxu1 %v3920_v32 }
 0x6f7   : > { %2012 = vmatprep.subr.bf16.mxu0 %v3924_v35  ;;  %2053 = vmatprep.subr.bf16.mxu1 %v3928_v44 }
 0x6fa   : > { %2013 = vmatpush1.bf16.msra.mxu0 %v3932_v1  ;;  %2054 = vmatpush1.bf16.msra.mxu1 %v3936_v49 }
 0x6fb   : > { %2014 = vmatprep.subr.bf16.mxu0 %v3940_v50  ;;  %2055 = vmatprep.subr.bf16.mxu1 %v3944_v51 }
 0x6fe   : > { %2015 = vmatpush1.bf16.msra.mxu0 %v3948_v53  ;;  %2056 = vmatpush1.bf16.msra.mxu1 %v3952_v57 }
 0x6ff   : > { %2016 = vmatprep.subr.bf16.mxu0 %v3956_v58  ;;  %2057 = vmatprep.subr.bf16.mxu1 %v3960_v60 }
 0x702   : > { %2017 = vmatpush1.bf16.msra.mxu0 %v3964_v61  ;;  %2058 = vmatpush1.bf16.msra.mxu1 %v3968_v62  ;;  %v1983_v61 = vpop.permute.xlu0 %1982 }
 0x703   : > { %vm1984_vm15 = vcmp.eq.s32.totalorder %v1983_v61, 1 }
 0x7b8   : > { %v1901_v30 = vpop.f32.mrb[40].mxu0  ;;  %v1942_v52 = vpop.f32.mrb[40].mxu1 }
 0x7b9   : > { %v1949_v4 = vadd.f32 %v2536_v0, %v1901_v30  ;;  %v1903_v37 = vpop.f32.mrb[41].mxu0  ;;  %v1944_v38 = vpop.f32.mrb[41].mxu1  ;;  %v1951_v32 = vadd.f32 %v2538_v29, %v1942_v52 }
 0x7ba   : > { %v1950_v39 = vadd.f32 %v2537_v36, %v1903_v37  ;;  %v1905_v40 = vpop.f32.mrb[42].mxu0  ;;  %v1946_v41 = vpop.f32.mrb[42].mxu1  ;;  %v1952_v28 = vadd.f32 %v2539_v27, %v1944_v38 }
 0x7bb   : > { %v2540_v42 = vmul.f32 -1.442695, %v1949_v4  ;;  %v1906_v20 = vpop.f32.mrb[43].mxu0  ;;  %v1947_v21 = vpop.f32.mrb[43].mxu1 }
 0x7bc   : > { %v2541_v22 = vmul.f32 -1.442695, %v1950_v39  ;;  %v2542_v31 = vmul.f32 -1.442695, %v1952_v28  ;;  %v2118_v40 = vpop.permute.xlu1 %2117 }
 0x7bd   : > { %2861 = vpow2.f32 %v2540_v42  ;;  %vm2119_vm0 = vcmp.eq.s32.totalorder %v2118_v40, 1 }
 0x7be   : > { %2863 = vpow2.f32 %v2541_v22 }
 0x7bf   : > { %2865 = vpow2.f32 %v2542_v31 }
 0x7c0   : > { %2867 = vtanh.f32 %v1951_v32 }
 0x7c7   : > { %v2862_v35 = vpop.eup %2861 }
 0x7c8   : > { %v2864_v44 = vpop.eup %2863  ;;  %v1956_v1 = vadd.f32 1.0, %v2862_v35 }
 0x7c9   : > { %v1962_v49 = vadd.f32 1.0, %v2864_v44  ;;  %v2866_v50 = vpop.eup %2865 }
 0x7ca   : > { %2869 = vrcp.f32 %v1956_v1  ;;  %v2868_v51 = vpop.eup %2867  ;;  %v1969_v60 = vadd.f32 1.0, %v2866_v50 }
 0x7cb   : > { %2871 = vrcp.f32 %v1962_v49 }
 0x7cc   : > { %2873 = vrcp.f32 %v1969_v60 }
 0x7d4   : > { %v2870_v53 = vpop.eup %2869 }
 0x7d5   : > { %v2872_v57 = vpop.eup %2871  ;;  %v1973_v58 = vmul.f32 %v2870_v53, %v2868_v51 }
 0x7d6   : > { %v1972_v62 = vmul.f32 %v2872_v57, %v4022_v18  ;;  %v2874_v59 = vpop.eup %2873 }
 0x7d8   : > { %v1974_v6 = vadd.f32 %v1973_v58, %v1972_v62 }
 0x7da   : > { %2875 = vtanh.f32 %v1974_v6  ;;  %v1991_v12 = vsel %vm1984_vm15, %v1974_v6, %v4022_v18  ;;  %v2548_v18 = vld [vmem:[%s2307_s8 + $0xf0] sm:$0xff] }
 0x7e4   : > { %v2876_v5 = vpop.eup %2875 }
 0x7e5   : > { %v1976_v10 = vmul.f32 %v2876_v5, %v2874_v59 }
 0x7e7   : > { %v1985_v23 = vsel %vm1984_vm15, %v1976_v10, 0.0  ;;  %v4069_v24 = vsel %vm1984_vm15, %v1976_v10, %v4027_v54 }
 0x7e8   : > { %v1986_v47 = vpack.c.bf16 %v1985_v23, %v1985_v23  ;;  %v2001_v48 = vpack.c.bf16 %v4069_v24, %v4069_v24 }
 0x7ea   : > { %2035 = vmatmul.mubr.bf16.vlgmr.msra.gmra.mrb[44].mxu0 %v2001_v48  ;;  %2544 = vst [vmem:[%s2303_s1 + $0x18] sm:$0xf] %v1986_v47  ;;  %2076 = vmatmul.mubr.bf16.vlgmr.msra.gmra.mrb[44].mxu1 %v2001_v48  ;;  %s3142_s1 = smov [#allocation12]  }
 0x7eb   : > { %s3017_s9 = sshll.u32 %s3142_s1, 4  ;;  %s3018_s9 = int_to_ptr.vmem [resolvable:$false] %s3017_s9 }
 0x7ec   : > { %s3019_s8 = scalar_lea.vmem %s3018_s9, 256  ;;  %p3020_p1 = scmp.lt.s32.totalorder %s4089_s27, %s3018_s9 }
 0x7ed   : > { %p3021_p4 = scmp.lt.s32.totalorder %s3019_s8, %s3013_s29 }
 0x7ef   : > { %p3022_p8 = por %p3021_p4, %p3020_p1 }
 0x7f1   : > { %p3023_p0 = pnand %p3022_p8, %p3016_p13 }
 0x8bd   : > { %v2036_v16 = vpop.f32.mrb[44].mxu0  ;;  %v2077_v17 = vpop.f32.mrb[44].mxu1 }
 0x8be   : > { %v2084_v25 = vadd.f32 %v2546_v15, %v2036_v16  ;;  %v2038_v19 = vpop.f32.mrb[45].mxu0  ;;  %v2079_v63 = vpop.f32.mrb[45].mxu1  ;;  %v2086_v13 = vadd.f32 %v2548_v18, %v2077_v17 }
 0x8bf   : > { %v2085_v2 = vadd.f32 %v2547_v26, %v2038_v19  ;;  %v2040_v3 = vpop.f32.mrb[46].mxu0  ;;  %v2081_v7 = vpop.f32.mrb[46].mxu1  ;;  %v2087_v14 = vadd.f32 %v2549_v45, %v2079_v63 }
 0x8c0   : > { %v2550_v8 = vmul.f32 -1.442695, %v2084_v25  ;;  %v2041_v9 = vpop.f32.mrb[47].mxu0  ;;  %v2082_v11 = vpop.f32.mrb[47].mxu1 }
 0x8c1   : > { %v2551_v43 = vmul.f32 -1.442695, %v2085_v2  ;;  %v2552_v46 = vmul.f32 -1.442695, %v2087_v14 }
 0x8c2   : > { %2877 = vpow2.f32 %v2550_v8 }
 0x8c3   : > { %2879 = vpow2.f32 %v2551_v43 }
 0x8c4   : > { %2881 = vpow2.f32 %v2552_v46 }
 0x8c5   : > { %2883 = vtanh.f32 %v2086_v13 }
 0x8cc   : > { %v2878_v55 = vpop.eup %2877 }
 0x8cd   : > { %v2880_v56 = vpop.eup %2879  ;;  %v2091_v54 = vadd.f32 1.0, %v2878_v55 }
 0x8ce   : > { %v2097_v33 = vadd.f32 1.0, %v2880_v56  ;;  %v2882_v34 = vpop.eup %2881 }
 0x8cf   : > { %2885 = vrcp.f32 %v2091_v54  ;;  %v2884_v0 = vpop.eup %2883  ;;  %v2104_v36 = vadd.f32 1.0, %v2882_v34 }
 0x8d0   : > { %2887 = vrcp.f32 %v2097_v33 }
 0x8d1   : > { %2889 = vrcp.f32 %v2104_v36 }
 0x8d9   : > { %v2886_v30 = vpop.eup %2885 }
 0x8da   : > { %v2888_v52 = vpop.eup %2887  ;;  %v2108_v4 = vmul.f32 %v2886_v30, %v2884_v0 }
 0x8db   : > { %v2107_v37 = vmul.f32 %v2888_v52, %v1991_v12  ;;  %v2890_v39 = vpop.eup %2889 }
 0x8dd   : > { %v2109_v38 = vadd.f32 %v2108_v4, %v2107_v37 }
 0x8df   : > { %2891 = vtanh.f32 %v2109_v38 }
 0x8e9   : > { %v2892_v41 = vpop.eup %2891 }
 0x8ea   : > { %v2111_v42 = vmul.f32 %v2892_v41, %v2890_v39 }
 0x8ec   : > { %v2120_v20 = vsel %vm2119_vm0, %v2111_v42, 0.0  ;;  %v2125_v21 = vsel %vm2119_vm0, %v2111_v42, %v4069_v24 }
 0x8ed   : > { %v2121_v22 = vpack.c.bf16 %v2120_v20, %v2120_v20  ;;  %2132 = vst [vmem:[%s404_s19] sm:$0xff] %v2125_v21 }
 0x8ee   : > { %3026 = shalt.err (!%p3023_p0)
}
 0x8ef   : > { %s3027_s18 = scalar_lea.hbm %s4087_s20, 128  ;;  %s3031_s19 = scalar_lea.hbm %s4173_s6, 256 }
 0x8f0   : > { %p3028_p11 = scmp.ne.s32.totalorder %s4087_s20, %s3027_s18  ;;  %p3032_p5 = scmp.lt.u32.totalorder %s4087_s20, %s4173_s6 }
 0x8f1   : > { %p3033_p6 = scmp.lt.u32.totalorder %s3031_s19, %s3027_s18  ;;  %p3035_p9 = scmp.lt.u32.totalorder %s3027_s18, %s4087_s20 }
 0x8f2   : > { %p3029_p3 = pnand %p3028_p11, %p4213_p7 }
 0x8f3   : > { %p3034_p2 = por %p3033_p6, %p3032_p5 }
 0x8f4   : > { %p3030_p10 = pneg %p3029_p3 }
 0x8f5   : > { %p3036_p12 = por %p3035_p9, %p3034_p2 }
 0x8f7   : > { %p3037_p13 = pnand %p3036_p12, %p3030_p10 }
 0x8f9   : > { %3040 = shalt.err (!%p3037_p13)
}
 0x8fa   : > { %2581 = dma.vmem_to_hbm [thread:$0]  (%p4213_p7), %s4089_s27, 128, %s4087_s20, %s2139_s24   ;;  %2554 = vst [vmem:[%s4081_s15 + $0x1c] sm:$0xf] %v2121_v22 }
 0x8fb   : > { %s2134_s7 = scalar_lea.sflag [#allocation7], %s3383_s13  ;;  %s3041_s30 = scalar_lea.vmem %s4077_s14, 512 }
 0x8fc   : > { %p3042_p1 = scmp.ne.s32.totalorder %s4077_s14, %s3041_s30  ;;  %s3143_s17 = smov [#allocation11]  }
 0x8fd   : > { %s3045_s29 = sshll.u32 %s3143_s17, 4  ;;  %s3046_s29 = int_to_ptr.vmem [resolvable:$false] %s3045_s29 }
 0x8fe   : > { %p3043_p4 = pnand %p3042_p1, %p4213_p7  ;;  %s3047_s1 = scalar_lea.vmem %s3046_s29, 1024 }
 0x8ff   : > { %p3048_p0 = scmp.lt.s32.totalorder %s4077_s14, %s3046_s29  ;;  %p3049_p11 = scmp.lt.s32.totalorder %s3047_s1, %s3041_s30 }
 0x900   : > { %p3044_p8 = pneg %p3043_p4 }
 0x901   : > { %p3050_p3 = por %p3049_p11, %p3048_p0 }
 0x903   : > { %p3051_p10 = pnand %p3050_p3, %p3044_p8 }
 0x905   : > { %3054 = shalt.err (!%p3051_p10)
}
 0x906   : > { %s3055_s27 = scalar_lea.hbm %s4094_s11, 512  ;;  %s3059_s24 = scalar_lea.hbm %s4172_s5, 1024 }
 0x907   : > { %p3056_p5 = scmp.ne.s32.totalorder %s4094_s11, %s3055_s27  ;;  %p3060_p9 = scmp.lt.u32.totalorder %s4094_s11, %s4172_s5 }
 0x908   : > { %p3061_p12 = scmp.lt.u32.totalorder %s3059_s24, %s3055_s27  ;;  %p3063_p1 = scmp.lt.u32.totalorder %s3055_s27, %s4094_s11 }
 0x909   : > { %p3057_p6 = pnand %p3056_p5, %p4213_p7 }
 0x90a   : > { %p3062_p13 = por %p3061_p12, %p3060_p9 }
 0x90b   : > { %p3058_p2 = pneg %p3057_p6 }
 0x90c   : > { %p3064_p4 = por %p3063_p1, %p3062_p13 }
 0x90e   : > { %p3065_p8 = pnand %p3064_p4, %p3058_p2 }
 0x910   : > { %3068 = shalt.err (!%p3065_p8)
}
 0x911   : > { %s3144_s18 = smov 64   ;;  %s3145_s28 = smov 128  }
 0x912   : > { %s3146_s23 = smov 4  }
 0x913   : > { %2580 = dma.vmem_to_hbm [thread:$0]  (%p4213_p7), %s4077_s14, 512, %s4094_s11, %s2134_s7, %s3144_s18, %s3145_s28, %s3146_s23  }
 0x914 PF: > { %s2186_s19 = sand.u32 1, %s3111_s21   ;;  %p4214_p0 = scmp.ne.s32.totalorder %s4196_s12, 0 }
 0x915   : > { %p4215_p11 = scmp.ge.s32.totalorder %s3131_s26, 2  ;;  %s2187_s16 = scalar_lea.sflag [#allocation7], %s2186_s19 }
 0x917   : > { %p2595_p3 = pnand %p4215_p11, %p4214_p0 }
 0x919   : > { %3102 = dma.done.wait (!%p2595_p3), %s2187_s16, 512  }
 0x91a   : > { %3104 = vsyncadd (!%p2595_p3), %s2187_s16, 4294966784  ;;  %s2196_s25 = scalar_lea.sflag [#allocation13], %s2186_s19 }
 0x91b   : > { %3106 = dma.done.wait (!%p2595_p3), %s2196_s25, 128  }
 0x91c   : > { %3108 = vsyncadd (!%p2595_p3), %s2196_s25, 4294967168  ;;  %s29_s26 = sadd.s32 1, %s3131_s26   ;;  %s4216_s10 = sld [smem:[#allocation18_spill]] }
 0x91d   : > { %p26_p10 = scmp.ge.s32.totalorder %s29_s26, 4   ;;  %s4217_s23 = sld [smem:[#allocation21_spill]] }
 0x91e   : > { %s4218_s24 = sld [smem:[#allocation19_spill]]  ;;  %s4219_s25 = sld [smem:[#allocation20_spill]] }
 0x91f   : > { %s4220_s21 = smov %s3115_s22  ;;  %28 = sbr.rel (!%p26_p10) target bundleno = 12 (0xc), region = 153 }
 0x922   : > { %s4221_s22 = smov %s4216_s10 }
 0x926   :  { %2201 = vsyncpa [#allocation6], 1 }
 0x927   :  { %2203 = vsyncpa [#allocation6 + $0x1], 1 }
 0x928   :  { %2204 = vsyncpa [#allocation9], 1 }
 0x929   :  { %2206 = vsyncpa [#allocation9 + $0x1], 1 }
 0x92a   :  { %2207 = vsyncpa [#allocation7], 1 }
 0x92b   :  { %2209 = vsyncpa [#allocation7 + $0x1], 1 }
 0x92c   :  { %2210 = vsyncpa [#allocation13], 1 }
 0x92d   :  { %2212 = vsyncpa [#allocation13 + $0x1], 1 }

</bundles_post_ra>
